<compile_context>
chip_gen: v7x
topology: tpu7x:2x2x1
jax: 0.10.0
libtpu: 0.0.40
codegen_flags: <defaults>
</compile_context>

<pallas_src>
import functools
import math

import jax
import jax.numpy as jnp
from jax import lax
from jax.experimental import pallas as pl
from jax.experimental.pallas import tpu as pltpu

BN_EPS = 1e-5


# ---------------------------------------------------------------------------
# Fused kernel: (banded 3x3 conv -> BN(batch stats) -> ReLU) x 2, lane-dense
# ---------------------------------------------------------------------------
def _up_double_conv_kernel(x_ref, bw1_ref, bw2_ref, fold_ref,
                           g1_ref, b1_ref, g2_ref, b2_ref, out_ref,
                           *, img_rows, inv_n):
    # x_ref    : [B*H, W*C1p]        bf16  concat(up, imgs), channel-padded, lane layout w*C1p+c
    # bw1_ref  : [W*C1p, 3*W*C]      bf16  block-banded conv1 weight (kw folded into the band)
    # bw2_ref  : [W*C,   3*W*C]      bf16  block-banded conv2 weight
    # fold_ref : [W*C, W*C]          f32   F[i,j] = (i%C == j%C): folds per-(w,c) lane sums
    #                                      into per-channel sums, tiled back across lanes
    # g*/b*    : [1, W*C]            f32   BatchNorm gamma/beta, channel-tiled across lanes
    # out_ref  : [B*H, W*C]          f32   lane-dense output slab (NHWC flattened)
    H = img_rows
    M, WC = out_ref.shape
    f32 = jnp.float32

    # Row index within each image: the kh=0 / kh=2 row shifts below must not
    # leak across image (batch) boundaries, and realize the zero row-padding.
    row_in_img = lax.broadcasted_iota(jnp.int32, (M, WC), 0) % H

    def band_conv(lhs_bf16, bw_ref):
        # ONE MXU matmul per conv (kw and Cin are folded into the banded weight;
        # structural zeros cost MXU flops only, which is not the bottleneck here).
        y = jnp.dot(lhs_bf16, bw_ref[...], preferred_element_type=f32)   # [M, 3*WC]
        # Combine the three kh terms with sublane rolls (XLU) + iota masks.
        # All lane slices are at multiples of WC (=128 here) -> aligned.
        above = jnp.where(row_in_img > 0,
                          pltpu.roll(y[:, 0:WC], 1, 0), 0.0)             # input row h-1
        mid = y[:, WC:2 * WC]                                            # input row h
        below = jnp.where(row_in_img < H - 1,
                          pltpu.roll(y[:, 2 * WC:3 * WC], M - 1, 0), 0.0)  # input row h+1
        return above + mid + below                                       # [M, WC] f32

    def bn_relu(h, g_ref, b_ref):
        # Training-mode batch statistics, centered two-pass variance.
        s = jnp.sum(h, axis=0, keepdims=True)                            # [1, WC]
        mu = jnp.dot(s, fold_ref[...], preferred_element_type=f32) * inv_n
        d = h - mu
        v = jnp.sum(d * d, axis=0, keepdims=True)                        # [1, WC]
        var = jnp.dot(v, fold_ref[...], preferred_element_type=f32) * inv_n
        # Fused BN affine + ReLU: two VPU passes over h (rsqrt is on the EUP).
        scale = g_ref[...] * lax.rsqrt(var + BN_EPS)
        shift = b_ref[...] - mu * scale
        return jnp.maximum(h * scale + shift, 0.0)

    h1 = bn_relu(band_conv(x_ref[...], bw1_ref), g1_ref, b1_ref)          # [M, WC] f32
    h2 = bn_relu(band_conv(h1.astype(jnp.bfloat16), bw2_ref), g2_ref, b2_ref)
    out_ref[...] = h2                                                     # unmasked 128-lane stores


# ---------------------------------------------------------------------------
# Wrapper-side weight packing
# ---------------------------------------------------------------------------
def _make_band_weight(wt, width):
    """Block-banded matmul weight for a 3x3, pad=1 conv on a [rows, W*Cin] slab.

    wt: [Cout, Cin, 3, 3] (PyTorch OIHW). Returns BAND [W*Cin, 3*W*Cout] bf16 with
      BAND[j*Cin+ci, kh*W*Cout + w*Cout + co] = wt[co, ci, kh, j-w+1] if 0<=j-w+1<3 else 0.
    Out-of-range kw taps are simply absent from the band == zero width-padding.
    """
    cout, cin = wt.shape[0], wt.shape[1]
    j = jnp.arange(width)[:, None, None]
    w = jnp.arange(width)[None, :, None]
    kw = jnp.arange(3)[None, None, :]
    sel = (j == w + kw - 1).astype(wt.dtype)                 # [W(j), W(w), 3(kw)]
    band = jnp.einsum('jwk,oihk->jihwo', sel, wt)            # [W, Cin, 3, W, Cout]
    return band.reshape(width * cin, 3 * width * cout).astype(jnp.bfloat16)


def _make_fold_matrix(width, c):
    """F[i, j] = 1 iff i%c == j%c: per-channel lane fold, result tiled over lanes."""
    i = jnp.arange(width * c)
    return (i[:, None] % c == i[None, :] % c).astype(jnp.float32)


# ---------------------------------------------------------------------------
# Wrapper: upconv (XLA) -> concat/layout prep -> single fused pallas_call -> NCHW
# ---------------------------------------------------------------------------
def up_forward(x, imgs_1, params):
    """x: [B, Cin, Hi, Wi] NCHW,  imgs_1: [B, 32, 2*Hi, 2*Wi] NCHW."""
    B, Cin, Hi, Wi = x.shape
    w_up, b_up = params["w_up"], params["b_up"]        # [Cin, Cup, 2, 2], [Cup]
    Cup = w_up.shape[1]
    H, W = 2 * Hi, 2 * Wi

    # ConvTranspose2d(k=2, s=2): non-overlapping outputs -> tiny K=Cin contraction
    # plus a stride-2 pixel interleave; left to XLA (per review guidance).
    y = jnp.einsum('bcij,codk->bidjko', x, w_up)        # [B, Hi, 2, Wi, 2, Cup]
    up = y.reshape(B, H, W, Cup) + b_up                 # NHWC

    # torch.cat([up, imgs_1], dim=1): up-channels first (weight packing matches).
    imgs = jnp.transpose(imgs_1, (0, 2, 3, 1))          # [B, H, W, 32]
    cat = jnp.concatenate([up, imgs], axis=-1)          # [B, H, W, C1]
    C1 = cat.shape[-1]

    w1, w2 = params["w1"], params["w2"]                 # [Cout, Cin, 3, 3] OIHW
    Cmid, Cout = w1.shape[0], w2.shape[0]
    assert Cmid == Cout                                 # DoubleConv: both convs -> out_channels

    # Pad channels (with matching zero weight rows) so W*C1p is a multiple of 128
    # -> the LHS slab rows and the matmul K are exactly lane-aligned. Skipped if
    # the pad would be large; jnp.dot handles unaligned K correctly anyway.
    lane_q = max(1, 128 // math.gcd(W, 128))
    pad_c = (-C1) % lane_q
    if pad_c > 16:
        pad_c = 0
    C1p = C1 + pad_c
    if pad_c:
        cat = jnp.pad(cat, ((0, 0), (0, 0), (0, 0), (0, pad_c)))
        w1 = jnp.pad(w1, ((0, 0), (0, pad_c), (0, 0), (0, 0)))

    # bf16 operands for the MXU are cast here, so the DMA into VMEM already
    # carries half the bytes and the kernel never does a full-slab cast pass.
    x2d = cat.reshape(B * H, W * C1p).astype(jnp.bfloat16)      # [B*H, W*C1p]

    bw1 = _make_band_weight(w1, W)                      # [W*C1p, 3*W*Cmid] bf16
    bw2 = _make_band_weight(w2, W)                      # [W*Cmid, 3*W*Cout] bf16
    fold = _make_fold_matrix(W, Cout)                   # [W*C, W*C] f32
    g1 = jnp.tile(params["gamma1"], W).reshape(1, W * Cmid)
    bb1 = jnp.tile(params["beta1"], W).reshape(1, W * Cmid)
    g2 = jnp.tile(params["gamma2"], W).reshape(1, W * Cout)
    bb2 = jnp.tile(params["beta2"], W).reshape(1, W * Cout)

    vspec = pl.BlockSpec(memory_space=pltpu.MemorySpace.VMEM)
    kernel = functools.partial(_up_double_conv_kernel,
                               img_rows=H, inv_n=1.0 / (B * H * W))

    out2d = pl.pallas_call(
        kernel,
        out_shape=jax.ShapeDtypeStruct((B * H, W * Cout), jnp.float32),
        in_specs=[vspec] * 8,
        out_specs=vspec,
        compiler_params=pltpu.CompilerParams(
            # Actual residency at the test shapes is ~1.2 MiB of operands
            # (x2d 144 KiB, bw1 864 KiB, bw2 96 KiB, fold 64 KiB, out 32 KiB)
            # plus <0.5 MiB of live values; 16 MiB leaves ample headroom on
            # every generation (v7x physical VMEM is 64 MiB).
            vmem_limit_bytes=16 * 1024 * 1024,
        ),
    )(x2d, bw1, bw2, fold, g1, bb1, g2, bb2)

    return jnp.transpose(out2d.reshape(B, H, W, Cout), (0, 3, 1, 2))   # NCHW


# ---------------------------------------------------------------------------
# Pure-JAX f32 reference (training-mode BatchNorm), for a loose-tolerance check
# ---------------------------------------------------------------------------
def up_reference(x, imgs_1, params):
    B, _, Hi, Wi = x.shape
    up = jnp.einsum('bcij,codk->bidjko', x, params["w_up"])
    up = up.reshape(B, 2 * Hi, 2 * Wi, -1) + params["b_up"]
    h = jnp.concatenate([up, jnp.transpose(imgs_1, (0, 2, 3, 1))], axis=-1)

    def conv_bn_relu(h, w, gamma, beta):
        k = jnp.transpose(w, (2, 3, 1, 0))                              # OIHW -> HWIO
        h = lax.conv_general_dilated(h, k, (1, 1), "SAME",
                                     dimension_numbers=("NHWC", "HWIO", "NHWC"),
                                     precision=lax.Precision.HIGHEST)
        mu = jnp.mean(h, axis=(0, 1, 2), keepdims=True)
        var = jnp.mean((h - mu) ** 2, axis=(0, 1, 2), keepdims=True)
        return jnp.maximum((h - mu) * lax.rsqrt(var + BN_EPS) * gamma + beta, 0.0)

    h = conv_bn_relu(h, params["w1"], params["gamma1"], params["beta1"])
    h = conv_bn_relu(h, params["w2"], params["gamma2"], params["beta2"])
    return jnp.transpose(h, (0, 3, 1, 2))


# ---------------------------------------------------------------------------
# Deterministic parameter construction (shapes from Up.__init__)
# ---------------------------------------------------------------------------
def init_params(key, in_channels, out_channels):
    cup = in_channels // 2
    c1_in = cup + 32
    c_mid = out_channels // 2
    ks = jax.random.split(key, 8)
    return {
        "w_up":   0.1 * jax.random.normal(ks[0], (in_channels, cup, 2, 2), jnp.float32),
        "b_up":   0.1 * jax.random.normal(ks[1], (cup,), jnp.float32),
        "w1":     0.1 * jax.random.normal(ks[2], (c_mid, c1_in, 3, 3), jnp.float32),
        "gamma1": 1.0 + 0.1 * jax.random.normal(ks[3], (c_mid,), jnp.float32),
        "beta1":  0.1 * jax.random.normal(ks[4], (c_mid,), jnp.float32),
        "w2":     0.1 * jax.random.normal(ks[5], (c_mid, c_mid, 3, 3), jnp.float32),
        "gamma2": 1.0 + 0.1 * jax.random.normal(ks[6], (c_mid,), jnp.float32),
        "beta2":  0.1 * jax.random.normal(ks[7], (c_mid,), jnp.float32),
    }


if __name__ == "__main__":
    in_channels, out_channels = 4, 8
    B, Hi, Wi = 2, 16, 16                               # x: [2, 4, 16, 16]
    key = jax.random.PRNGKey(0)
    kx, ki, kp = jax.random.split(key, 3)

    x = jax.random.normal(kx, (B, in_channels, Hi, Wi), jnp.float32)
    imgs_1 = jax.random.normal(ki, (B, 32, 2 * Hi, 2 * Wi), jnp.float32)
    params = init_params(kp, in_channels, out_channels)

    fwd = jax.jit(functools.partial(up_forward, params=params))
    out = fwd(x, imgs_1)
    jax.block_until_ready(out)

    assert out.shape == (B, out_channels // 2, 2 * Hi, 2 * Wi), out.shape
    assert bool(jnp.all(jnp.isfinite(out)))

    # Loose-tolerance check vs. an f32 reference (bf16 MXU operands in the
    # kernel => expect ~1e-2-level relative differences).
    ref = jax.jit(functools.partial(up_reference, params=params))(x, imgs_1)
    max_err = float(jnp.max(jnp.abs(out - ref)))
    ref_scale = float(jnp.max(jnp.abs(ref)))
    assert max_err <= 0.05 * ref_scale + 1e-4, (max_err, ref_scale)

    print("KERNEL_OK")
</pallas_src>

<mosaic_0001>
module attributes {stable_mosaic.version = 11 : i64} {
  func.func @_up_double_conv_kernel(%arg0: memref<64x1152xbf16, #tpu.memory_space<vmem>>, %arg1: memref<1152x384xbf16, #tpu.memory_space<vmem>>, %arg2: memref<128x384xbf16, #tpu.memory_space<vmem>>, %arg3: memref<128x128xf32, #tpu.memory_space<vmem>>, %arg4: memref<1x128xf32, #tpu.memory_space<vmem>>, %arg5: memref<1x128xf32, #tpu.memory_space<vmem>>, %arg6: memref<1x128xf32, #tpu.memory_space<vmem>>, %arg7: memref<1x128xf32, #tpu.memory_space<vmem>>, %arg8: memref<64x128xf32, #tpu.memory_space<vmem>>) attributes {dimension_semantics = [], scalar_prefetch = 0 : i64, scratch_operands = 0 : i64, tpu.core_type = #tpu.core_type<tc>} {
    %0 = tpu.iota {dimensions = array<i32: 0>} : vector<64x128xi32>
    %c32_i32 = arith.constant 32 : i32
    %c0_i32 = arith.constant 0 : i32
    %1 = arith.cmpi eq, %c32_i32, %c0_i32 : i32
    %c1_i32 = arith.constant 1 : i32
    %2 = arith.select %1, %c1_i32, %c32_i32 : i32
    %3 = vector.broadcast %2 : i32 to vector<64x128xi32>
    %4 = arith.remsi %0, %3 : vector<64x128xi32>
    %c0_i32_0 = arith.constant 0 : i32
    %5 = vector.broadcast %c0_i32_0 : i32 to vector<64x128xi32>
    %6 = arith.cmpi ne, %4, %5 : vector<64x128xi32>
    %c0_i32_1 = arith.constant 0 : i32
    %7 = vector.broadcast %c0_i32_1 : i32 to vector<64x128xi32>
    %8 = arith.cmpi slt, %4, %7 : vector<64x128xi32>
    %c0_i32_2 = arith.constant 0 : i32
    %9 = arith.cmpi slt, %2, %c0_i32_2 : i32
    %10 = vector.broadcast %9 : i1 to vector<64x128xi1>
    %11 = vector.broadcast %10 : vector<64x128xi1> to vector<64x128xi1>
    %12 = arith.xori %8, %11 : vector<64x128xi1>
    %13 = arith.andi %12, %6 : vector<64x128xi1>
    %14 = vector.broadcast %2 : i32 to vector<64x128xi32>
    %15 = arith.addi %4, %14 : vector<64x128xi32>
    %16 = arith.select %13, %15, %4 : vector<64x128xi1>, vector<64x128xi32>
    %c0 = arith.constant 0 : index
    %c0_3 = arith.constant 0 : index
    %17 = vector.load %arg0[%c0, %c0_3] : memref<64x1152xbf16, #tpu.memory_space<vmem>>, vector<64x1152xbf16>
    %c0_4 = arith.constant 0 : index
    %c0_5 = arith.constant 0 : index
    %18 = vector.load %arg1[%c0_4, %c0_5] : memref<1152x384xbf16, #tpu.memory_space<vmem>>, vector<1152x384xbf16>
    %cst = arith.constant dense<0.000000e+00> : vector<64x384xf32>
    %19 = tpu.matmul %17, %18, %cst {dimension_numbers = #tpu.dot_dimension_numbers<[1], [0], [0], [1], [0, 0, 1, 1], [], []>} : vector<64x1152xbf16>, vector<1152x384xbf16>, vector<64x384xf32> -> vector<64x384xf32>
    %c0_i32_6 = arith.constant 0 : i32
    %20 = vector.broadcast %c0_i32_6 : i32 to vector<64x128xi32>
    %21 = arith.cmpi sgt, %16, %20 : vector<64x128xi32>
    %22 = vector.extract_strided_slice %19 {offsets = [0, 0], sizes = [64, 128], strides = [1, 1]} : vector<64x384xf32> to vector<64x128xf32>
    %c1_i32_7 = arith.constant 1 : i32
    %23 = tpu.dynamic_rotate %22 by %c1_i32_7 dim 0 : vector<64x128xf32>, i32 -> vector<64x128xf32>
    %cst_8 = arith.constant 0.000000e+00 : f32
    %24 = vector.broadcast %cst_8 : f32 to vector<64x128xf32>
    %25 = arith.select %21, %23, %24 : vector<64x128xi1>, vector<64x128xf32>
    %26 = vector.extract_strided_slice %19 {offsets = [0, 128], sizes = [64, 128], strides = [1, 1]} : vector<64x384xf32> to vector<64x128xf32>
    %c31_i32 = arith.constant 31 : i32
    %27 = vector.broadcast %c31_i32 : i32 to vector<64x128xi32>
    %28 = arith.cmpi slt, %16, %27 : vector<64x128xi32>
    %29 = vector.extract_strided_slice %19 {offsets = [0, 256], sizes = [64, 128], strides = [1, 1]} : vector<64x384xf32> to vector<64x128xf32>
    %c63_i32 = arith.constant 63 : i32
    %30 = tpu.dynamic_rotate %29 by %c63_i32 dim 0 : vector<64x128xf32>, i32 -> vector<64x128xf32>
    %cst_9 = arith.constant 0.000000e+00 : f32
    %31 = vector.broadcast %cst_9 : f32 to vector<64x128xf32>
    %32 = arith.select %28, %30, %31 : vector<64x128xi1>, vector<64x128xf32>
    %33 = arith.addf %25, %26 : vector<64x128xf32>
    %34 = arith.addf %33, %32 : vector<64x128xf32>
    %cst_10 = arith.constant dense<0.000000e+00> : vector<128xf32>
    %35 = vector.multi_reduction <add>, %34, %cst_10 [0] : vector<64x128xf32> to vector<128xf32>
    %36 = vector.shape_cast %35 : vector<128xf32> to vector<1x128xf32>
    %c0_11 = arith.constant 0 : index
    %c0_12 = arith.constant 0 : index
    %37 = vector.load %arg3[%c0_11, %c0_12] : memref<128x128xf32, #tpu.memory_space<vmem>>, vector<128x128xf32>
    %cst_13 = arith.constant dense<0.000000e+00> : vector<1x128xf32>
    %38 = tpu.matmul %36, %37, %cst_13 {dimension_numbers = #tpu.dot_dimension_numbers<[1], [0], [0], [1], [0, 0, 1, 1], [], []>} : vector<1x128xf32>, vector<128x128xf32>, vector<1x128xf32> -> vector<1x128xf32>
    %cst_14 = arith.constant 4.8828125E-4 : f32
    %39 = vector.broadcast %cst_14 : f32 to vector<1x128xf32>
    %40 = arith.mulf %38, %39 : vector<1x128xf32>
    %41 = vector.broadcast %40 : vector<1x128xf32> to vector<64x128xf32>
    %42 = arith.subf %34, %41 : vector<64x128xf32>
    %43 = arith.mulf %42, %42 : vector<64x128xf32>
    %cst_15 = arith.constant dense<0.000000e+00> : vector<128xf32>
    %44 = vector.multi_reduction <add>, %43, %cst_15 [0] : vector<64x128xf32> to vector<128xf32>
    %45 = vector.shape_cast %44 : vector<128xf32> to vector<1x128xf32>
    %c0_16 = arith.constant 0 : index
    %c0_17 = arith.constant 0 : index
    %46 = vector.load %arg3[%c0_16, %c0_17] : memref<128x128xf32, #tpu.memory_space<vmem>>, vector<128x128xf32>
    %cst_18 = arith.constant dense<0.000000e+00> : vector<1x128xf32>
    %47 = tpu.matmul %45, %46, %cst_18 {dimension_numbers = #tpu.dot_dimension_numbers<[1], [0], [0], [1], [0, 0, 1, 1], [], []>} : vector<1x128xf32>, vector<128x128xf32>, vector<1x128xf32> -> vector<1x128xf32>
    %cst_19 = arith.constant 4.8828125E-4 : f32
    %48 = vector.broadcast %cst_19 : f32 to vector<1x128xf32>
    %49 = arith.mulf %47, %48 : vector<1x128xf32>
    %c0_20 = arith.constant 0 : index
    %c0_21 = arith.constant 0 : index
    %50 = vector.load %arg4[%c0_20, %c0_21] : memref<1x128xf32, #tpu.memory_space<vmem>>, vector<1x128xf32>
    %cst_22 = arith.constant 9.99999974E-6 : f32
    %51 = vector.broadcast %cst_22 : f32 to vector<1x128xf32>
    %52 = arith.addf %49, %51 : vector<1x128xf32>
    %53 = math.rsqrt %52 : vector<1x128xf32>
    %54 = arith.mulf %50, %53 : vector<1x128xf32>
    %c0_23 = arith.constant 0 : index
    %c0_24 = arith.constant 0 : index
    %55 = vector.load %arg5[%c0_23, %c0_24] : memref<1x128xf32, #tpu.memory_space<vmem>>, vector<1x128xf32>
    %56 = arith.mulf %40, %54 : vector<1x128xf32>
    %57 = arith.subf %55, %56 : vector<1x128xf32>
    %58 = vector.broadcast %54 : vector<1x128xf32> to vector<64x128xf32>
    %59 = arith.mulf %34, %58 : vector<64x128xf32>
    %60 = vector.broadcast %57 : vector<1x128xf32> to vector<64x128xf32>
    %61 = arith.addf %59, %60 : vector<64x128xf32>
    %cst_25 = arith.constant 0.000000e+00 : f32
    %62 = vector.broadcast %cst_25 : f32 to vector<64x128xf32>
    %63 = arith.maximumf %61, %62 : vector<64x128xf32>
    %64 = arith.truncf %63 : vector<64x128xf32> to vector<64x128xbf16>
    %c0_26 = arith.constant 0 : index
    %c0_27 = arith.constant 0 : index
    %65 = vector.load %arg2[%c0_26, %c0_27] : memref<128x384xbf16, #tpu.memory_space<vmem>>, vector<128x384xbf16>
    %cst_28 = arith.constant dense<0.000000e+00> : vector<64x384xf32>
    %66 = tpu.matmul %64, %65, %cst_28 {dimension_numbers = #tpu.dot_dimension_numbers<[1], [0], [0], [1], [0, 0, 1, 1], [], []>} : vector<64x128xbf16>, vector<128x384xbf16>, vector<64x384xf32> -> vector<64x384xf32>
    %c0_i32_29 = arith.constant 0 : i32
    %67 = vector.broadcast %c0_i32_29 : i32 to vector<64x128xi32>
    %68 = arith.cmpi sgt, %16, %67 : vector<64x128xi32>
    %69 = vector.extract_strided_slice %66 {offsets = [0, 0], sizes = [64, 128], strides = [1, 1]} : vector<64x384xf32> to vector<64x128xf32>
    %c1_i32_30 = arith.constant 1 : i32
    %70 = tpu.dynamic_rotate %69 by %c1_i32_30 dim 0 : vector<64x128xf32>, i32 -> vector<64x128xf32>
    %cst_31 = arith.constant 0.000000e+00 : f32
    %71 = vector.broadcast %cst_31 : f32 to vector<64x128xf32>
    %72 = arith.select %68, %70, %71 : vector<64x128xi1>, vector<64x128xf32>
    %73 = vector.extract_strided_slice %66 {offsets = [0, 128], sizes = [64, 128], strides = [1, 1]} : vector<64x384xf32> to vector<64x128xf32>
    %c31_i32_32 = arith.constant 31 : i32
    %74 = vector.broadcast %c31_i32_32 : i32 to vector<64x128xi32>
    %75 = arith.cmpi slt, %16, %74 : vector<64x128xi32>
    %76 = vector.extract_strided_slice %66 {offsets = [0, 256], sizes = [64, 128], strides = [1, 1]} : vector<64x384xf32> to vector<64x128xf32>
    %c63_i32_33 = arith.constant 63 : i32
    %77 = tpu.dynamic_rotate %76 by %c63_i32_33 dim 0 : vector<64x128xf32>, i32 -> vector<64x128xf32>
    %cst_34 = arith.constant 0.000000e+00 : f32
    %78 = vector.broadcast %cst_34 : f32 to vector<64x128xf32>
    %79 = arith.select %75, %77, %78 : vector<64x128xi1>, vector<64x128xf32>
    %80 = arith.addf %72, %73 : vector<64x128xf32>
    %81 = arith.addf %80, %79 : vector<64x128xf32>
    %cst_35 = arith.constant dense<0.000000e+00> : vector<128xf32>
    %82 = vector.multi_reduction <add>, %81, %cst_35 [0] : vector<64x128xf32> to vector<128xf32>
    %83 = vector.shape_cast %82 : vector<128xf32> to vector<1x128xf32>
    %c0_36 = arith.constant 0 : index
    %c0_37 = arith.constant 0 : index
    %84 = vector.load %arg3[%c0_36, %c0_37] : memref<128x128xf32, #tpu.memory_space<vmem>>, vector<128x128xf32>
    %cst_38 = arith.constant dense<0.000000e+00> : vector<1x128xf32>
    %85 = tpu.matmul %83, %84, %cst_38 {dimension_numbers = #tpu.dot_dimension_numbers<[1], [0], [0], [1], [0, 0, 1, 1], [], []>} : vector<1x128xf32>, vector<128x128xf32>, vector<1x128xf32> -> vector<1x128xf32>
    %cst_39 = arith.constant 4.8828125E-4 : f32
    %86 = vector.broadcast %cst_39 : f32 to vector<1x128xf32>
    %87 = arith.mulf %85, %86 : vector<1x128xf32>
    %88 = vector.broadcast %87 : vector<1x128xf32> to vector<64x128xf32>
    %89 = arith.subf %81, %88 : vector<64x128xf32>
    %90 = arith.mulf %89, %89 : vector<64x128xf32>
    %cst_40 = arith.constant dense<0.000000e+00> : vector<128xf32>
    %91 = vector.multi_reduction <add>, %90, %cst_40 [0] : vector<64x128xf32> to vector<128xf32>
    %92 = vector.shape_cast %91 : vector<128xf32> to vector<1x128xf32>
    %c0_41 = arith.constant 0 : index
    %c0_42 = arith.constant 0 : index
    %93 = vector.load %arg3[%c0_41, %c0_42] : memref<128x128xf32, #tpu.memory_space<vmem>>, vector<128x128xf32>
    %cst_43 = arith.constant dense<0.000000e+00> : vector<1x128xf32>
    %94 = tpu.matmul %92, %93, %cst_43 {dimension_numbers = #tpu.dot_dimension_numbers<[1], [0], [0], [1], [0, 0, 1, 1], [], []>} : vector<1x128xf32>, vector<128x128xf32>, vector<1x128xf32> -> vector<1x128xf32>
    %cst_44 = arith.constant 4.8828125E-4 : f32
    %95 = vector.broadcast %cst_44 : f32 to vector<1x128xf32>
    %96 = arith.mulf %94, %95 : vector<1x128xf32>
    %c0_45 = arith.constant 0 : index
    %c0_46 = arith.constant 0 : index
    %97 = vector.load %arg6[%c0_45, %c0_46] : memref<1x128xf32, #tpu.memory_space<vmem>>, vector<1x128xf32>
    %cst_47 = arith.constant 9.99999974E-6 : f32
    %98 = vector.broadcast %cst_47 : f32 to vector<1x128xf32>
    %99 = arith.addf %96, %98 : vector<1x128xf32>
    %100 = math.rsqrt %99 : vector<1x128xf32>
    %101 = arith.mulf %97, %100 : vector<1x128xf32>
    %c0_48 = arith.constant 0 : index
    %c0_49 = arith.constant 0 : index
    %102 = vector.load %arg7[%c0_48, %c0_49] : memref<1x128xf32, #tpu.memory_space<vmem>>, vector<1x128xf32>
    %103 = arith.mulf %87, %101 : vector<1x128xf32>
    %104 = arith.subf %102, %103 : vector<1x128xf32>
    %105 = vector.broadcast %101 : vector<1x128xf32> to vector<64x128xf32>
    %106 = arith.mulf %81, %105 : vector<64x128xf32>
    %107 = vector.broadcast %104 : vector<1x128xf32> to vector<64x128xf32>
    %108 = arith.addf %106, %107 : vector<64x128xf32>
    %cst_50 = arith.constant 0.000000e+00 : f32
    %109 = vector.broadcast %cst_50 : f32 to vector<64x128xf32>
    %110 = arith.maximumf %108, %109 : vector<64x128xf32>
    %c0_51 = arith.constant 0 : index
    %c0_52 = arith.constant 0 : index
    %111 = vector.load %arg8[%c0_51, %c0_52] : memref<64x128xf32, #tpu.memory_space<vmem>>, vector<64x128xf32>
    tpu.vector_store %arg8[%c0_51, %c0_52], %110 {strides = array<i32>} : memref<64x128xf32, #tpu.memory_space<vmem>>, vector<64x128xf32>,
    return
  }
}

</mosaic_0001>

<bundles_post_ra>
// kernel: tile.18
= control target key start
LH: loop header
LB: loop body
LE: loop exit
PB: predicated region body
PF: predicated region fallthrough
CT: control target
= control target key end

     0   :  { %s40_s0 = inlined_call_operand.vmem [shape: f32[4], index: 0, kind: input, shape index: {}]   ;;  %s41_s1 = inlined_call_operand.vmem [shape: f32[32,4], index: 1, kind: output, shape index: {}]  }
   0x1   :  { %v4_v0 = vld [vmem:[%s40_s0] ss:$0 sm:$0xff] }
   0x2   :  { %5 = vst [vmem:[%s41_s1] sm:$0xff] %v4_v0  ;;  %12 = vst [vmem:[%s41_s1 + $0x8] sm:$0xff] %v4_v0 }
   0x3   :  { %13 = vst [vmem:[%s41_s1 + $0x10] sm:$0xff] %v4_v0  ;;  %14 = vst [vmem:[%s41_s1 + $0x18] sm:$0xff] %v4_v0 }

// kernel: tile.19
= control target key start
LH: loop header
LB: loop body
LE: loop exit
PB: predicated region body
PF: predicated region fallthrough
CT: control target
= control target key end

     0   :  { %s259_s10 = smov 124   ;;  %s260_s11 = smov 116   ;;  %vm3_vm0 = vcmask 31744   ;;  %vm9_vm1 = vcmask 1048544   ;;  %vm15_vm2 = vcmask 1015744   ;;  %vm21_vm3 = vcmask 982944   ;;  %s399_s0 = inlined_call_operand.vmem [shape: f32[32,4], index: 0, kind: input, shape index: {}]   ;;  %s400_s1 = inlined_call_operand.vmem [shape: f32[1,128], index: 1, kind: output, shape index: {}]  }
   0x1   :  { %v197_v0 = vld [vmem:[%s399_s0 + $0x1f] sm:$0x1]   ;;  %v199_v1 = vld [vmem:[%s399_s0 + $0x1d] sm:$0x1]   ;;  %v198_v2 = vld [vmem:[%s399_s0 + $0x1e] sm:$0x1]  }
   0x2   :  { %7 = vrot.lane.b32.xlu0 %v197_v0, %s259_s10  ;;  %19 = vrot.lane.b32.xlu1 %v199_v1, %s260_s11  ;;  %v200_v3 = vld [vmem:[%s399_s0 + $0x1c] sm:$0x1]   ;;  %s261_s16 = smov 120   ;;  %s262_s17 = smov 112   ;;  %v201_v4 = vld [vmem:[%s399_s0 + $0x1b] sm:$0x1]  }
   0x3   :  { %v202_v5 = vld [vmem:[%s399_s0 + $0x1a] sm:$0x1]   ;;  %s263_s22 = smov 108   ;;  %s264_s23 = smov 104   ;;  %v203_v6 = vld [vmem:[%s399_s0 + $0x19] sm:$0x1]  }
   0x4   :  { %v204_v7 = vld [vmem:[%s399_s0 + $0x18] sm:$0x1]   ;;  %s265_s28 = smov 100   ;;  %s266_s29 = smov 96   ;;  %v205_v8 = vld [vmem:[%s399_s0 + $0x17] sm:$0x1]  }
   0x5   :  { %v206_v9 = vld [vmem:[%s399_s0 + $0x16] sm:$0x1]   ;;  %v2_v10 = vld [vmem:[%s399_s0] sm:$0x1]   ;;  %s267_s7 = smov 92   ;;  %s268_s8 = smov 88  }
   0x6   :  { %13 = vrot.lane.b32.xlu0 %v198_v2, %s261_s16  ;;  %25 = vrot.lane.b32.xlu1 %v200_v3, %s262_s17  ;;  %4 = vst.msk [vmem:[#allocation0] sm:$0x1] %vm3_vm0, %v2_v10   ;;  %v207_v11 = vld [vmem:[%s399_s0 + $0x15] sm:$0x1]   ;;  %v208_v12 = vld [vmem:[%s399_s0 + $0x14] sm:$0x1]  }
   0x7   :  { %s269_s13 = smov 84   ;;  %s270_s14 = smov 80   ;;  %v209_v13 = vld [vmem:[%s399_s0 + $0x13] sm:$0x1]   ;;  %v210_v14 = vld [vmem:[%s399_s0 + $0x12] sm:$0x1]  }
   0x8   :  { %s271_s19 = smov 76   ;;  %s272_s20 = smov 72   ;;  %v211_v15 = vld [vmem:[%s399_s0 + $0x11] sm:$0x1]   ;;  %v212_v16 = vld [vmem:[%s399_s0 + $0x10] sm:$0x1]  }
   0x9   :  { %s273_s25 = smov 68   ;;  %s274_s26 = smov 64   ;;  %v213_v17 = vld [vmem:[%s399_s0 + $0xf] sm:$0x1]   ;;  %v214_v18 = vld [vmem:[%s399_s0 + $0xe] sm:$0x1]  }
   0xa   :  { %31 = vrot.lane.b32.xlu0 %v201_v4, %s263_s22  ;;  %37 = vrot.lane.b32.xlu1 %v202_v5, %s264_s23  ;;  %s275_s2 = smov 60   ;;  %s276_s3 = smov 56   ;;  %v215_v19 = vld [vmem:[%s399_s0 + $0xd] sm:$0x1]   ;;  %v216_v20 = vld [vmem:[%s399_s0 + $0xc] sm:$0x1]  }
   0xb   :  { %s278_s9 = smov 48   ;;  %v217_v21 = vld [vmem:[%s399_s0 + $0xb] sm:$0x1]   ;;  %v218_v22 = vld [vmem:[%s399_s0 + $0xa] sm:$0x1]   ;;  %s280_s15 = smov 40  }
   0xc   :  { %v219_v23 = vld [vmem:[%s399_s0 + $0x9] sm:$0x1]   ;;  %v220_v24 = vld [vmem:[%s399_s0 + $0x8] sm:$0x1]   ;;  %s282_s21 = smov 32   ;;  %s284_s27 = smov 24  }
   0xd   :  { %v221_v25 = vld [vmem:[%s399_s0 + $0x7] sm:$0x1]   ;;  %v222_v26 = vld [vmem:[%s399_s0 + $0x6] sm:$0x1]   ;;  %v223_v27 = vld [vmem:[%s399_s0 + $0x5] sm:$0x1]  }
   0xe   :  { %43 = vrot.lane.b32.xlu0 %v203_v6, %s265_s28  ;;  %49 = vrot.lane.b32.xlu1 %v204_v7, %s266_s29  ;;  %v224_v28 = vld [vmem:[%s399_s0 + $0x4] sm:$0x1]   ;;  %s286_s4 = smov 16   ;;  %v225_v29 = vld [vmem:[%s399_s0 + $0x3] sm:$0x1]   ;;  %s288_s10 = smov 8  }
   0xf   :  { %v226_v30 = vld [vmem:[%s399_s0 + $0x2] sm:$0x1]   ;;  %v227_v31 = vld [vmem:[%s399_s0 + $0x1] sm:$0x1]   ;;  %s289_s0 = smov 4   ;;  %vm27_vm4 = vcmask 950144  }
  0x10   :  { %vm33_vm5 = vcmask 917344   ;;  %vm39_vm6 = vcmask 884544   ;;  %vm45_vm7 = vcmask 851744   ;;  %vm51_vm8 = vcmask 818944  }
  0x11   :  { %vm57_vm9 = vcmask 786144   ;;  %vm63_vm10 = vcmask 753344   ;;  %vm69_vm11 = vcmask 720544   ;;  %vm75_vm12 = vcmask 687744  }
  0x12   :  { %55 = vrot.lane.b32.xlu0 %v205_v8, %s267_s7  ;;  %61 = vrot.lane.b32.xlu1 %v206_v9, %s268_s8  ;;  %s277_s8 = smov 52   ;;  %vm81_vm13 = vcmask 654944   ;;  %vm87_vm14 = vcmask 622144   ;;  %vm93_vm15 = vcmask 589344   ;;  %vm99_vm0 = vcmask 556544  }
  0x16   :  { %67 = vrot.lane.b32.xlu0 %v207_v11, %s269_s13  ;;  %73 = vrot.lane.b32.xlu1 %v208_v12, %s270_s14  ;;  %s279_s14 = smov 44  }
  0x1a   :  { %79 = vrot.lane.b32.xlu0 %v209_v13, %s271_s19  ;;  %85 = vrot.lane.b32.xlu1 %v210_v14, %s272_s20  ;;  %s281_s20 = smov 36  }
  0x1e   :  { %91 = vrot.lane.b32.xlu0 %v211_v15, %s273_s25  ;;  %97 = vrot.lane.b32.xlu1 %v212_v16, %s274_s26  ;;  %s283_s26 = smov 28  }
  0x22   :  { %103 = vrot.lane.b32.xlu0 %v213_v17, %s275_s2  ;;  %109 = vrot.lane.b32.xlu1 %v214_v18, %s276_s3  ;;  %s285_s3 = smov 20  }
  0x26   :  { %115 = vrot.lane.b32.xlu0 %v215_v19, %s277_s8  ;;  %121 = vrot.lane.b32.xlu1 %v216_v20, %s278_s9  ;;  %s287_s9 = smov 12  }
  0x2a   :  { %127 = vrot.lane.b32.xlu0 %v217_v21, %s279_s14  ;;  %133 = vrot.lane.b32.xlu1 %v218_v22, %s280_s15 }
  0x2e   :  { %139 = vrot.lane.b32.xlu0 %v219_v23, %s281_s20  ;;  %145 = vrot.lane.b32.xlu1 %v220_v24, %s282_s21 }
  0x32   :  { %151 = vrot.lane.b32.xlu0 %v221_v25, %s283_s26  ;;  %157 = vrot.lane.b32.xlu1 %v222_v26, %s284_s27 }
  0x36   :  { %163 = vrot.lane.b32.xlu0 %v223_v27, %s285_s3  ;;  %169 = vrot.lane.b32.xlu1 %v224_v28, %s286_s4 }
  0x3a   :  { %175 = vrot.lane.b32.xlu0 %v225_v29, %s287_s9  ;;  %181 = vrot.lane.b32.xlu1 %v226_v30, %s288_s10 }
  0x3e   :  { %187 = vrot.lane.b32.xlu0 %v227_v31, %s289_s0 }
  0x74   :  { %v8_v32 = vpop.permute.xlu0 %7   ;;  %v20_v33 = vpop.permute.xlu1 %19  }
  0x75   :  { %10 = vst.msk [vmem:[#allocation0] sm:$0x1] %vm9_vm1, %v8_v32   ;;  %vm105_vm1 = vcmask 523744  }
  0x78   :  { %v14_v34 = vpop.permute.xlu0 %13   ;;  %v26_v35 = vpop.permute.xlu1 %25  }
  0x79   :  { %16 = vst.msk [vmem:[#allocation0] sm:$0x1] %vm15_vm2, %v14_v34   ;;  %vm111_vm2 = vcmask 490944  }
  0x7a   :  { %22 = vst.msk [vmem:[#allocation0] sm:$0x1] %vm21_vm3, %v20_v33   ;;  %vm117_vm3 = vcmask 458144  }
  0x7b   :  { %28 = vst.msk [vmem:[#allocation0] sm:$0x1] %vm27_vm4, %v26_v35   ;;  %vm123_vm4 = vcmask 425344  }
  0x7c   :  { %v32_v36 = vpop.permute.xlu0 %31   ;;  %v38_v37 = vpop.permute.xlu1 %37  }
  0x7d   :  { %34 = vst.msk [vmem:[#allocation0] sm:$0x1] %vm33_vm5, %v32_v36   ;;  %vm129_vm5 = vcmask 392544  }
  0x7e   :  { %40 = vst.msk [vmem:[#allocation0] sm:$0x1] %vm39_vm6, %v38_v37   ;;  %vm135_vm6 = vcmask 359744  }
  0x80   :  { %v44_v38 = vpop.permute.xlu0 %43   ;;  %v50_v39 = vpop.permute.xlu1 %49  }
  0x81   :  { %46 = vst.msk [vmem:[#allocation0] sm:$0x1] %vm45_vm7, %v44_v38   ;;  %vm141_vm7 = vcmask 326944  }
  0x82   :  { %52 = vst.msk [vmem:[#allocation0] sm:$0x1] %vm51_vm8, %v50_v39   ;;  %vm147_vm8 = vcmask 294144  }
  0x84   :  { %v56_v40 = vpop.permute.xlu0 %55   ;;  %v62_v41 = vpop.permute.xlu1 %61  }
  0x85   :  { %58 = vst.msk [vmem:[#allocation0] sm:$0x1] %vm57_vm9, %v56_v40   ;;  %vm153_vm9 = vcmask 261344  }
  0x86   :  { %64 = vst.msk [vmem:[#allocation0] sm:$0x1] %vm63_vm10, %v62_v41   ;;  %vm159_vm10 = vcmask 228544  }
  0x88   :  { %v68_v42 = vpop.permute.xlu0 %67   ;;  %v74_v43 = vpop.permute.xlu1 %73  }
  0x89   :  { %70 = vst.msk [vmem:[#allocation0] sm:$0x1] %vm69_vm11, %v68_v42   ;;  %vm165_vm11 = vcmask 195744  }
  0x8a   :  { %76 = vst.msk [vmem:[#allocation0] sm:$0x1] %vm75_vm12, %v74_v43   ;;  %vm171_vm12 = vcmask 162944  }
  0x8c   :  { %v80_v44 = vpop.permute.xlu0 %79   ;;  %v86_v45 = vpop.permute.xlu1 %85  }
  0x8d   :  { %82 = vst.msk [vmem:[#allocation0] sm:$0x1] %vm81_vm13, %v80_v44   ;;  %vm177_vm13 = vcmask 130144  }
  0x8e   :  { %88 = vst.msk [vmem:[#allocation0] sm:$0x1] %vm87_vm14, %v86_v45   ;;  %vm183_vm14 = vcmask 97344  }
  0x90   :  { %v92_v46 = vpop.permute.xlu0 %91   ;;  %v98_v47 = vpop.permute.xlu1 %97  }
  0x91   :  { %94 = vst.msk [vmem:[#allocation0] sm:$0x1] %vm93_vm15, %v92_v46   ;;  %vm189_vm15 = vcmask 64544  }
  0x92   :  { %100 = vst.msk [vmem:[#allocation0] sm:$0x1] %vm99_vm0, %v98_v47  }
  0x94   :  { %v104_v48 = vpop.permute.xlu0 %103   ;;  %v110_v49 = vpop.permute.xlu1 %109  }
  0x95   :  { %106 = vst.msk [vmem:[#allocation0] sm:$0x1] %vm105_vm1, %v104_v48  }
  0x96   :  { %112 = vst.msk [vmem:[#allocation0] sm:$0x1] %vm111_vm2, %v110_v49  }
  0x98   :  { %v116_v50 = vpop.permute.xlu0 %115   ;;  %v122_v51 = vpop.permute.xlu1 %121  }
  0x99   :  { %118 = vst.msk [vmem:[#allocation0] sm:$0x1] %vm117_vm3, %v116_v50  }
  0x9a   :  { %124 = vst.msk [vmem:[#allocation0] sm:$0x1] %vm123_vm4, %v122_v51  }
  0x9c   :  { %v128_v52 = vpop.permute.xlu0 %127   ;;  %v134_v53 = vpop.permute.xlu1 %133  }
  0x9d   :  { %130 = vst.msk [vmem:[#allocation0] sm:$0x1] %vm129_vm5, %v128_v52  }
  0x9e   :  { %136 = vst.msk [vmem:[#allocation0] sm:$0x1] %vm135_vm6, %v134_v53  }
  0xa0   :  { %v140_v54 = vpop.permute.xlu0 %139   ;;  %v146_v55 = vpop.permute.xlu1 %145  }
  0xa1   :  { %142 = vst.msk [vmem:[#allocation0] sm:$0x1] %vm141_vm7, %v140_v54  }
  0xa2   :  { %148 = vst.msk [vmem:[#allocation0] sm:$0x1] %vm147_vm8, %v146_v55  }
  0xa4   :  { %v152_v56 = vpop.permute.xlu0 %151   ;;  %v158_v57 = vpop.permute.xlu1 %157  }
  0xa5   :  { %154 = vst.msk [vmem:[#allocation0] sm:$0x1] %vm153_vm9, %v152_v56  }
  0xa6   :  { %160 = vst.msk [vmem:[#allocation0] sm:$0x1] %vm159_vm10, %v158_v57  }
  0xa8   :  { %v164_v58 = vpop.permute.xlu0 %163   ;;  %v170_v59 = vpop.permute.xlu1 %169  }
  0xa9   :  { %166 = vst.msk [vmem:[#allocation0] sm:$0x1] %vm165_vm11, %v164_v58  }
  0xaa   :  { %172 = vst.msk [vmem:[#allocation0] sm:$0x1] %vm171_vm12, %v170_v59  }
  0xac   :  { %v176_v60 = vpop.permute.xlu0 %175   ;;  %v182_v61 = vpop.permute.xlu1 %181  }
  0xad   :  { %178 = vst.msk [vmem:[#allocation0] sm:$0x1] %vm177_vm13, %v176_v60  }
  0xae   :  { %184 = vst.msk [vmem:[#allocation0] sm:$0x1] %vm183_vm14, %v182_v61  }
  0xb0   :  { %v188_v62 = vpop.permute.xlu0 %187  }
  0xb1   :  { %190 = vst.msk [vmem:[#allocation0] sm:$0x1] %vm189_vm15, %v188_v62  }
  0xb8   :  { %v194_v63 = vld [vmem:[#allocation0] sm:$0x1] }
  0xb9   :  { %196 = vst [vmem:[%s400_s1] sm:$0x1] %v194_v63 }

// kernel: up_forward.1
= control target key start
LH: loop header
LB: loop body
LE: loop exit
PB: predicated region body
PF: predicated region fallthrough
CT: control target
= control target key end

     0   :  { %vm4685_vm1 = vmmov 0   ;;  %s6107_s1 = inlined_call_operand.vmem [shape: bf16[1152,384], index: 1, kind: input, shape index: {}]   ;;  %s6108_s0 = inlined_call_operand.vmem [shape: bf16[64,1152], index: 0, kind: input, shape index: {}]   ;;  %s6109_s3 = inlined_call_operand.vmem [shape: f32[128,128], index: 3, kind: input, shape index: {}]   ;;  %s6110_s2 = inlined_call_operand.vmem [shape: bf16[128,384], index: 2, kind: input, shape index: {}]   ;;  %s6111_s4 = inlined_call_operand.vmem [shape: f32[1,128], index: 4, kind: input, shape index: {}]   ;;  %s6112_s5 = inlined_call_operand.vmem [shape: f32[1,128], index: 5, kind: input, shape index: {}]   ;;  %s6113_s6 = inlined_call_operand.vmem [shape: f32[1,128], index: 6, kind: input, shape index: {}]   ;;  %s6114_s7 = inlined_call_operand.vmem [shape: f32[1,128], index: 7, kind: input, shape index: {}]   ;;  %s6115_s8 = inlined_call_operand.vmem [shape: f32[64,128], index: 8, kind: output, shape index: {}]  }
   0x1   :  { %v4307_v0 = vld [vmem:[%s6107_s1 + $0x4] ss:$12 sps:$4 sm:$0xff]   ;;  %v4309_v1 = vld [vmem:[%s6107_s1] ss:$12 sps:$4 sm:$0xff]   ;;  %v4310_v2 = vld [vmem:[%s6107_s1 + $0x1c] ss:$12 sps:$4 sm:$0xff]  }
   0x2   :  { %1799 = vmatprep.subr.bf16.mxu0 %v4307_v0  ;;  %v4312_v3 = vld [vmem:[%s6107_s1 + $0x18] ss:$12 sps:$4 sm:$0xff]   ;;  %v4313_v4 = vld [vmem:[%s6107_s1 + $0x34] ss:$12 sps:$4 sm:$0xff]   ;;  %v4315_v5 = vld [vmem:[%s6107_s1 + $0x30] ss:$12 sps:$4 sm:$0xff]  }
   0x3   :  { %1800 = vmatpush1.bf16.msra.mxu0 %v4309_v1  ;;  %v4316_v6 = vld [vmem:[%s6107_s1 + $0x4c] ss:$12 sps:$4 sm:$0xff]   ;;  %v4324_v7 = vld [vmem:[%s6107_s1 + $0xc8] ss:$12 sps:$4 sm:$0xff]   ;;  %v4319_v11 = vld [vmem:[%s6107_s1 + $0x64] ss:$12 sps:$4 sm:$0xff]  }
   0x4   :  { %1801 = vmatprep.subr.bf16.mxu0 %v4310_v2  ;;  %v4326_v8 = vld [vmem:[%s6107_s1 + $0x8] ss:$12 sps:$4 sm:$0xff]   ;;  %3703 = vmatprep.subr.bf16.mxu1 %v4324_v7  ;;  %v4329_v10 = vld [vmem:[%s6107_s1 + $0xe0] ss:$12 sps:$4 sm:$0xff]   ;;  %v4334_v15 = vld [vmem:[%s6107_s1 + $0xf8] ss:$12 sps:$4 sm:$0xff]  }
   0x5   :  { %v4318_v9 = vld [vmem:[%s6107_s1 + $0x48] ss:$12 sps:$4 sm:$0xff]   ;;  %3704 = vmatpush3.bf16.msra.mxu1 %v4326_v8  ;;  %v4331_v12 = vld [vmem:[%s6107_s1 + $0x20] ss:$12 sps:$4 sm:$0xff]   ;;  %v4336_v16 = vld [vmem:[%s6107_s1 + $0x38] ss:$12 sps:$4 sm:$0xff]  }
   0x6   :  { %3705 = vmatprep.subr.bf16.mxu1 %v4329_v10  ;;  %v4321_v13 = vld [vmem:[%s6107_s1 + $0x60] ss:$12 sps:$4 sm:$0xff]   ;;  %v4322_v14 = vld [vmem:[%s6107_s1 + $0x7c] ss:$12 sps:$4 sm:$0xff]   ;;  %v4325_v17 = vld [vmem:[%s6107_s1 + $0x78] ss:$12 sps:$4 sm:$0xff]  }
   0x7   :  { %1802 = vmatpush1.bf16.msra.mxu0 %v4312_v3  ;;  %v4339_v18 = vld [vmem:[%s6107_s1 + $0x110] ss:$12 sps:$4 sm:$0xff]   ;;  %v4327_v20 = vld [vmem:[%s6107_s1 + $0x94] ss:$12 sps:$4 sm:$0xff]   ;;  %v4332_v24 = vld [vmem:[%s6107_s1 + $0xac] ss:$12 sps:$4 sm:$0xff]  }
   0x8   :  { %1803 = vmatprep.subr.bf16.mxu0 %v4313_v4  ;;  %v4341_v19 = vld [vmem:[%s6107_s1 + $0x50] ss:$12 sps:$4 sm:$0xff]   ;;  %v4344_v21 = vld [vmem:[%s6107_s1 + $0x128] ss:$12 sps:$4 sm:$0xff]   ;;  %v4349_v25 = vld [vmem:[%s6107_s1 + $0x140] ss:$12 sps:$4 sm:$0xff]  }
   0x9   :  { %3706 = vmatpush3.bf16.msra.mxu1 %v4331_v12  ;;  %v4330_v22 = vld [vmem:[%s6107_s1 + $0x90] ss:$12 sps:$4 sm:$0xff]   ;;  %v4346_v23 = vld [vmem:[%s6107_s1 + $0x68] ss:$12 sps:$4 sm:$0xff]   ;;  %v4351_v27 = vld [vmem:[%s6107_s1 + $0x80] ss:$12 sps:$4 sm:$0xff]  }
   0xa   :  { %3707 = vmatprep.subr.bf16.mxu1 %v4334_v15  ;;  %v4335_v26 = vld [vmem:[%s6107_s1 + $0xa8] ss:$12 sps:$4 sm:$0xff]   ;;  %v4337_v28 = vld [vmem:[%s6107_s1 + $0xc4] ss:$12 sps:$4 sm:$0xff]   ;;  %v4340_v30 = vld [vmem:[%s6107_s1 + $0xc0] ss:$12 sps:$4 sm:$0xff]  }
   0xb   :  { %1804 = vmatpush1.bf16.msra.mxu0 %v4315_v5  ;;  %v4354_v29 = vld [vmem:[%s6107_s1 + $0x158] ss:$12 sps:$4 sm:$0xff]   ;;  %v4342_v31 = vld [vmem:[%s6107_s1 + $0xdc] ss:$12 sps:$4 sm:$0xff]   ;;  %v4347_v37 = vld [vmem:[%s6107_s1 + $0xf4] ss:$12 sps:$4 sm:$0xff]  }
   0xc   :  { %1805 = vmatprep.subr.bf16.mxu0 %v4316_v6  ;;  %v4356_v32 = vld [vmem:[%s6107_s1 + $0x98] ss:$12 sps:$4 sm:$0xff]   ;;  %v4359_v33 = vld [vmem:[%s6107_s1 + $0x170] ss:$12 sps:$4 sm:$0xff]   ;;  %v4367_v38 = vld [vmem:[%s6107_s1 + $0x248] ss:$12 sps:$4 sm:$0xff]  }
   0xd   :  { %3708 = vmatpush3.bf16.msra.mxu1 %v4336_v16  ;;  %v4345_v34 = vld [vmem:[%s6107_s1 + $0xd8] ss:$12 sps:$4 sm:$0xff]   ;;  %v4361_v36 = vld [vmem:[%s6107_s1 + $0xb0] ss:$12 sps:$4 sm:$0xff]   ;;  %v4369_v42 = vld [vmem:[%s6107_s1 + $0x188] ss:$12 sps:$4 sm:$0xff]  }
   0xe   :  { %3709 = vmatprep.subr.bf16.mxu1 %v4339_v18  ;;  %v4364_v35 = vld [vmem:[%s6108_s0 + $0x4] ss:$36 sps:$4 sm:$0xff]   ;;  %v4350_v39 = vld [vmem:[%s6107_s1 + $0xf0] ss:$12 sps:$4 sm:$0xff]   ;;  %v4352_v40 = vld [vmem:[%s6107_s1 + $0x10c] ss:$12 sps:$4 sm:$0xff]  }
   0xf   :  { %1806 = vmatpush1.bf16.msra.mxu0 %v4318_v9  ;;  %2196 = vmatprep.mubr.bf16.mxu1 %v4364_v35  ;;  %v4858_v41 = vld [vmem:[%s6108_s0] ss:$36 sps:$4 sm:$0xff]   ;;  %v4870_v44 = vld [vmem:[%s6108_s0 + $0x4c] ss:$36 sps:$4 sm:$0xff]   ;;  %v4355_v45 = vld [vmem:[%s6107_s1 + $0x108] ss:$12 sps:$4 sm:$0xff]  }
  0x10   :  { %1807 = vmatprep.subr.bf16.mxu0 %v4319_v11  ;;  %1831 = vmatprep.mubr.bf16.mxu0 %v4364_v35  ;;  %v4372_v43 = vld [vmem:[%s6107_s1 + $0x260] ss:$12 sps:$4 sm:$0xff]   ;;  %v4357_v47 = vld [vmem:[%s6107_s1 + $0x124] ss:$12 sps:$4 sm:$0xff]   ;;  %v4365_v50 = vld [vmem:[%s6107_s1 + $0x13c] ss:$12 sps:$4 sm:$0xff]  }
  0x11   :  { %3710 = vmatpush3.bf16.msra.mxu1 %v4341_v19  ;;  %v4374_v46 = vld [vmem:[%s6107_s1 + $0x1a0] ss:$12 sps:$4 sm:$0xff]   ;;  %v4380_v48 = vld [vmem:[%s6107_s1 + $0x278] ss:$12 sps:$4 sm:$0xff]   ;;  %v4386_v53 = vld [vmem:[%s6107_s1 + $0x290] ss:$12 sps:$4 sm:$0xff]  }
  0x12   :  { %3711 = vmatprep.subr.bf16.mxu1 %v4344_v21  ;;  %v4360_v49 = vld [vmem:[%s6107_s1 + $0x120] ss:$12 sps:$4 sm:$0xff]   ;;  %v4382_v52 = vld [vmem:[%s6107_s1 + $0x1b8] ss:$12 sps:$4 sm:$0xff]   ;;  %v4387_v57 = vld [vmem:[%s6107_s1 + $0x1d0] ss:$12 sps:$4 sm:$0xff]  }
  0x13   :  { %1808 = vmatpush1.bf16.msra.mxu0 %v4321_v13  ;;  %v4894_v51 = vld [vmem:[%s6108_s0 + $0x48] ss:$36 sps:$4 sm:$0xff]   ;;  %v4906_v54 = vld [vmem:[%s6108_s0 + $0x94] ss:$36 sps:$4 sm:$0xff]   ;;  %v4373_v59 = vld [vmem:[%s6107_s1 + $0x150] ss:$12 sps:$4 sm:$0xff]  }
  0x14   :  { %1809 = vmatprep.subr.bf16.mxu0 %v4322_v14  ;;  %v4368_v55 = vld [vmem:[%s6107_s1 + $0x138] ss:$12 sps:$4 sm:$0xff]   ;;  %v4370_v56 = vld [vmem:[%s6107_s1 + $0x154] ss:$12 sps:$4 sm:$0xff]   ;;  %v4392_v6 = vld [vmem:[%s6107_s1 + $0x19c] ss:$12 sps:$4 sm:$0xff]  }
  0x15   :  { %3712 = vmatpush3.bf16.msra.mxu1 %v4346_v23  ;;  %v4394_v58 = vld [vmem:[%s6107_s1 + $0x2a8] ss:$12 sps:$4 sm:$0xff]   ;;  %v4377_v60 = vld [vmem:[%s6107_s1 + $0x16c] ss:$12 sps:$4 sm:$0xff]   ;;  %v4942_v0 = vld [vmem:[%s6108_s0 + $0xdc] ss:$36 sps:$4 sm:$0xff]  }
  0x16   :  { %3713 = vmatprep.subr.bf16.mxu1 %v4349_v25  ;;  %v4930_v61 = vld [vmem:[%s6108_s0 + $0x90] ss:$36 sps:$4 sm:$0xff]   ;;  %v4399_v63 = vld [vmem:[%s6107_s1 + $0x2c0] ss:$12 sps:$4 sm:$0xff]   ;;  %v4407_v4 = vld [vmem:[%s6107_s1 + $0x2d8] ss:$12 sps:$4 sm:$0xff]  }
  0x17   :  { %1810 = vmatpush1.bf16.msra.mxu0 %v4325_v17  ;;  %v4395_v62 = vld [vmem:[%s6107_s1 + $0x1e8] ss:$12 sps:$4 sm:$0xff]   ;;  %v4385_v2 = vld [vmem:[%s6107_s1 + $0x184] ss:$12 sps:$4 sm:$0xff]   ;;  %v4400_v3 = vld [vmem:[%s6107_s1 + $0x200] ss:$12 sps:$4 sm:$0xff]  }
  0x18   :  { %1811 = vmatprep.subr.bf16.mxu0 %v4327_v20  ;;  %v4381_v1 = vld [vmem:[%s6107_s1 + $0x168] ss:$12 sps:$4 sm:$0xff]   ;;  %v4383_v5 = vld [vmem:[%s6107_s1 + $0x180] ss:$12 sps:$4 sm:$0xff]   ;;  %v4966_v7 = vld [vmem:[%s6108_s0 + $0xd8] ss:$36 sps:$4 sm:$0xff]  }
  0x19   :  { %3714 = vmatpush3.bf16.msra.mxu1 %v4351_v27  ;;  %v4408_v8 = vld [vmem:[%s6107_s1 + $0x218] ss:$12 sps:$4 sm:$0xff]   ;;  %v4412_v9 = vld [vmem:[%s6107_s1 + $0x2f0] ss:$12 sps:$4 sm:$0xff]   ;;  %v4398_v12 = vld [vmem:[%s6107_s1 + $0x1b4] ss:$12 sps:$4 sm:$0xff]  }
  0x1a   :  { %3715 = vmatprep.subr.bf16.mxu1 %v4354_v29  ;;  %v4390_v10 = vld [vmem:[%s6107_s1 + $0x198] ss:$12 sps:$4 sm:$0xff]   ;;  %v4982_v11 = vld [vmem:[%s6108_s0 + $0xc] ss:$36 sps:$4 sm:$0xff]   ;;  %v4420_v14 = vld [vmem:[%s6107_s1 + $0x3c8] ss:$12 sps:$4 sm:$0xff]  }
  0x1b   :  { %1812 = vmatpush1.bf16.msra.mxu0 %v4330_v22  ;;  %v4413_v13 = vld [vmem:[%s6107_s1 + $0x230] ss:$12 sps:$4 sm:$0xff]   ;;  %v4405_v16 = vld [vmem:[%s6107_s1 + $0x1cc] ss:$12 sps:$4 sm:$0xff]   ;;  %v4421_v18 = vld [vmem:[%s6107_s1 + $0x308] ss:$12 sps:$4 sm:$0xff]  }
  0x1c   :  { %1813 = vmatprep.subr.bf16.mxu0 %v4332_v24  ;;  %v4396_v15 = vld [vmem:[%s6107_s1 + $0x1b0] ss:$12 sps:$4 sm:$0xff]   ;;  %v5004_v17 = vld [vmem:[%s6108_s0 + $0x8] ss:$36 sps:$4 sm:$0xff]   ;;  %v5016_v20 = vld [vmem:[%s6108_s0 + $0x54] ss:$36 sps:$4 sm:$0xff]  }
  0x1d   :  { %3716 = vmatpush3.bf16.msra.mxu1 %v4356_v32  ;;  %v4425_v19 = vld [vmem:[%s6107_s1 + $0x3e0] ss:$12 sps:$4 sm:$0xff]   ;;  %v4403_v21 = vld [vmem:[%s6107_s1 + $0x1c8] ss:$12 sps:$4 sm:$0xff]   ;;  %v4411_v22 = vld [vmem:[%s6107_s1 + $0x1e4] ss:$12 sps:$4 sm:$0xff]  }
  0x1e   :  { %3717 = vmatprep.subr.bf16.mxu1 %v4359_v33  ;;  %v4426_v23 = vld [vmem:[%s6107_s1 + $0x320] ss:$12 sps:$4 sm:$0xff]   ;;  %v4433_v24 = vld [vmem:[%s6107_s1 + $0x3f8] ss:$12 sps:$4 sm:$0xff]   ;;  %v5042_v27 = vld [vmem:[%s6108_s0 + $0x50] ss:$36 sps:$4 sm:$0xff]  }
  0x1f   :  { %1814 = vmatpush1.bf16.msra.mxu0 %v4335_v26  ;;  %v4409_v25 = vld [vmem:[%s6107_s1 + $0x1e0] ss:$12 sps:$4 sm:$0xff]   ;;  %v4419_v26 = vld [vmem:[%s6107_s1 + $0x1fc] ss:$12 sps:$4 sm:$0xff]  }
  0x20   :  { %1815 = vmatprep.subr.bf16.mxu0 %v4337_v28  ;;  %v4434_v28 = vld [vmem:[%s6107_s1 + $0x338] ss:$12 sps:$4 sm:$0xff]   ;;  %v4438_v29 = vld [vmem:[%s6107_s1 + $0x410] ss:$12 sps:$4 sm:$0xff]   ;;  %v4424_v32 = vld [vmem:[%s6107_s1 + $0x214] ss:$12 sps:$4 sm:$0xff]  }
  0x21   :  { %3718 = vmatpush3.bf16.msra.mxu1 %v4361_v36  ;;  %v4439_v33 = vld [vmem:[%s6107_s1 + $0x350] ss:$12 sps:$4 sm:$0xff]   ;;  %v4431_v36 = vld [vmem:[%s6107_s1 + $0x22c] ss:$12 sps:$4 sm:$0xff]  }
  0x22   :  { %3743 = vmatprep.subr.bf16.mxu1 %v4367_v38  ;;  %v4422_v35 = vld [vmem:[%s6107_s1 + $0x210] ss:$12 sps:$4 sm:$0xff]   ;;  %v4447_v38 = vld [vmem:[%s6107_s1 + $0x368] ss:$12 sps:$4 sm:$0xff]  }
  0x23   :  { %1816 = vmatpush1.bf16.msra.mxu0 %v4340_v30  ;;  %v5054_v30 = vld [vmem:[%s6108_s0 + $0x9c] ss:$36 sps:$4 sm:$0xff]  }
  0x24   :  { %1817 = vmatprep.subr.bf16.mxu0 %v4342_v31  ;;  %2197 = vmatmul.mubr.bf16.vlgmr.msra.gmra.mrb[0].mxu1 %v4858_v41  ;;  %v4417_v31 = vld [vmem:[%s6107_s1 + $0x1f8] ss:$12 sps:$4 sm:$0xff]  }
  0x25   :  { %3744 = vmatpush3.bf16.msra.mxu1 %v4369_v42  ;;  %2204 = vmatprep.mubr.bf16.mxu1 %v4870_v44  ;;  %v4437_v42 = vld [vmem:[%s6107_s1 + $0x244] ss:$12 sps:$4 sm:$0xff]  }
  0x26   :  { %3745 = vmatprep.subr.bf16.mxu1 %v4372_v43  ;;  %v4452_v43 = vld [vmem:[%s6107_s1 + $0x380] ss:$12 sps:$4 sm:$0xff]  }
  0x27   :  { %1818 = vmatpush1.bf16.msra.mxu0 %v4345_v34  ;;  %v4446_v34 = vld [vmem:[%s6107_s1 + $0x428] ss:$12 sps:$4 sm:$0xff]  }
  0x28   :  { %1819 = vmatprep.subr.bf16.mxu0 %v4347_v37  ;;  %v5080_v37 = vld [vmem:[%s6108_s0 + $0x98] ss:$36 sps:$4 sm:$0xff]  }
  0x29   :  { %3746 = vmatpush3.bf16.msra.mxu1 %v4374_v46  ;;  %v4444_v46 = vld [vmem:[%s6107_s1 + $0x25c] ss:$12 sps:$4 sm:$0xff]  }
  0x2a   :  { %3747 = vmatprep.subr.bf16.mxu1 %v4380_v48  ;;  %v4460_v48 = vld [vmem:[%s6107_s1 + $0x398] ss:$12 sps:$4 sm:$0xff]  }
  0x2b   :  { %1820 = vmatpush1.bf16.msra.mxu0 %v4350_v39  ;;  %v4451_v39 = vld [vmem:[%s6107_s1 + $0x440] ss:$12 sps:$4 sm:$0xff]  }
  0x2c   :  { %1821 = vmatprep.subr.bf16.mxu0 %v4352_v40  ;;  %2205 = vmatmul.mubr.bf16.gmra.mrb[4].mxu1 %v4894_v51  ;;  %v5092_v40 = vld [vmem:[%s6108_s0 + $0xe4] ss:$36 sps:$4 sm:$0xff]  }
  0x2d   :  { %3748 = vmatpush3.bf16.msra.mxu1 %v4382_v52  ;;  %2212 = vmatprep.mubr.bf16.mxu1 %v4906_v54  ;;  %v4450_v52 = vld [vmem:[%s6107_s1 + $0x274] ss:$12 sps:$4 sm:$0xff]  }
  0x2e   :  { %3749 = vmatprep.subr.bf16.mxu1 %v4386_v53  ;;  %v4465_v53 = vld [vmem:[%s6107_s1 + $0x3b0] ss:$12 sps:$4 sm:$0xff]  }
  0x2f   :  { %1822 = vmatpush1.bf16.msra.mxu0 %v4355_v45  ;;  %v4435_v45 = vld [vmem:[%s6107_s1 + $0x240] ss:$12 sps:$4 sm:$0xff]  }
  0x30   :  { %1823 = vmatprep.subr.bf16.mxu0 %v4357_v47  ;;  %v5118_v47 = vld [vmem:[%s6108_s0 + $0xe0] ss:$36 sps:$4 sm:$0xff]  }
  0x31   :  { %3750 = vmatpush3.bf16.msra.mxu1 %v4387_v57  ;;  %v5154_v57 = vld [vmem:[%s6108_s0 + $0x10] ss:$36 sps:$4 sm:$0xff]  }
  0x32   :  { %3751 = vmatprep.subr.bf16.mxu1 %v4394_v58  ;;  %v4473_v58 = vld [vmem:[%s6107_s1 + $0x488] ss:$12 sps:$4 sm:$0xff]  }
  0x33   :  { %1824 = vmatpush1.bf16.msra.mxu0 %v4360_v49  ;;  %v4464_v49 = vld [vmem:[%s6107_s1 + $0x470] ss:$12 sps:$4 sm:$0xff]  }
  0x34   :  { %1825 = vmatprep.subr.bf16.mxu0 %v4365_v50  ;;  %2213 = vmatmul.mubr.bf16.gmra.mrb[8].mxu1 %v4930_v61  ;;  %v4442_v50 = vld [vmem:[%s6107_s1 + $0x258] ss:$12 sps:$4 sm:$0xff]  }
  0x35   :  { %3752 = vmatpush3.bf16.msra.mxu1 %v4395_v62  ;;  %2220 = vmatprep.mubr.bf16.mxu1 %v4942_v0  ;;  %v4463_v62 = vld [vmem:[%s6107_s1 + $0x2a4] ss:$12 sps:$4 sm:$0xff]  }
  0x36   :  { %3753 = vmatprep.subr.bf16.mxu1 %v4399_v63  ;;  %v4478_v63 = vld [vmem:[%s6107_s1 + $0x4a0] ss:$12 sps:$4 sm:$0xff]  }
  0x37   :  { %1826 = vmatpush1.bf16.msra.mxu0 %v4368_v55  ;;  %v4448_v55 = vld [vmem:[%s6107_s1 + $0x270] ss:$12 sps:$4 sm:$0xff]  }
  0x38   :  { %1827 = vmatprep.subr.bf16.mxu0 %v4370_v56  ;;  %v4457_v56 = vld [vmem:[%s6107_s1 + $0x28c] ss:$12 sps:$4 sm:$0xff]  }
  0x39   :  { %3754 = vmatpush3.bf16.msra.mxu1 %v4400_v3  ;;  %v5190_v3 = vld [vmem:[%s6108_s0 + $0x58] ss:$36 sps:$4 sm:$0xff]  }
  0x3a   :  { %3755 = vmatprep.subr.bf16.mxu1 %v4407_v4  ;;  %v4486_v4 = vld [vmem:[%s6107_s1 + $0x4b8] ss:$12 sps:$4 sm:$0xff]  }
  0x3b   :  { %1828 = vmatpush1.bf16.msra.mxu0 %v4373_v59  ;;  %v4477_v59 = vld [vmem:[%s6107_s1 + $0x560] ss:$12 sps:$4 sm:$0xff]  }
  0x3c   :  { %1829 = vmatprep.subr.bf16.mxu0 %v4377_v60  ;;  %2221 = vmatmul.mubr.bf16.gmra.mrb[12].mxu1 %v4966_v7  ;;  %v5166_v60 = vld [vmem:[%s6108_s0 + $0x5c] ss:$36 sps:$4 sm:$0xff]  }
  0x3d   :  { %3756 = vmatpush3.bf16.msra.mxu1 %v4408_v8  ;;  %2261 = vmatprep.mubr.bf16.mxu1 %v4982_v11  ;;  %v4476_v8 = vld [vmem:[%s6107_s1 + $0x2d4] ss:$12 sps:$4 sm:$0xff]  }
  0x3e   :  { %3757 = vmatprep.subr.bf16.mxu1 %v4412_v9  ;;  %v4491_v9 = vld [vmem:[%s6107_s1 + $0x4d0] ss:$12 sps:$4 sm:$0xff]  }
  0x3f   :  { %1830 = vmatpush1.bf16.msra.mxu0 %v4381_v1  ;;  %v4461_v1 = vld [vmem:[%s6107_s1 + $0x2a0] ss:$12 sps:$4 sm:$0xff]  }
  0x40   :  { %1872 = vmatprep.subr.bf16.mxu0 %v4385_v2  ;;  %v4471_v2 = vld [vmem:[%s6107_s1 + $0x2bc] ss:$12 sps:$4 sm:$0xff]  }
  0x41   :  { %3758 = vmatpush3.bf16.msra.mxu1 %v4413_v13  ;;  %v5226_v13 = vld [vmem:[%s6108_s0 + $0xa0] ss:$36 sps:$4 sm:$0xff]  }
  0x42   :  { %1832 = vmatmul.mubr.bf16.vlgmr.msra.gmra.mrb[0].mxu0 %v4858_v41  ;;  %3783 = vmatprep.subr.bf16.mxu1 %v4420_v14  ;;  %v4429_v41 = vld [vmem:[%s6107_s1 + $0x228] ss:$12 sps:$4 sm:$0xff]  }
  0x43   :  { %1873 = vmatpush1.bf16.msra.mxu0 %v4383_v5  ;;  %1841 = vmatprep.mubr.bf16.mxu0 %v4870_v44  ;;  %v4459_v44 = vld [vmem:[%s6107_s1 + $0x458] ss:$12 sps:$4 sm:$0xff]   ;;  %v4490_v5 = vld [vmem:[%s6107_s1 + $0x590] ss:$12 sps:$4 sm:$0xff]   ;;  %v4499_v14 = vld [vmem:[%s6107_s1 + $0x4e8] ss:$12 sps:$4 sm:$0xff]  }
  0x44   :  { %1874 = vmatprep.subr.bf16.mxu0 %v4392_v6  ;;  %2262 = vmatmul.mubr.bf16.vlgmr.msra.gmra.mrb[16].mxu1 %v5004_v17  ;;  %v5202_v6 = vld [vmem:[%s6108_s0 + $0xa4] ss:$36 sps:$4 sm:$0xff]  }
  0x45   :  { %3784 = vmatpush3.bf16.msra.mxu1 %v4421_v18  ;;  %2269 = vmatprep.mubr.bf16.mxu1 %v5016_v20  ;;  %v4481_v18 = vld [vmem:[%s6107_s1 + $0x2e8] ss:$12 sps:$4 sm:$0xff]  }
  0x46   :  { %3785 = vmatprep.subr.bf16.mxu1 %v4425_v19  ;;  %v4489_v19 = vld [vmem:[%s6107_s1 + $0x304] ss:$12 sps:$4 sm:$0xff]  }
  0x47   :  { %1875 = vmatpush1.bf16.msra.mxu0 %v4390_v10  ;;  %v4498_v10 = vld [vmem:[%s6107_s1 + $0x5a8] ss:$12 sps:$4 sm:$0xff]  }
  0x48   :  { %1876 = vmatprep.subr.bf16.mxu0 %v4398_v12  ;;  %v4483_v12 = vld [vmem:[%s6107_s1 + $0x2ec] ss:$12 sps:$4 sm:$0xff]  }
  0x49   :  { %3786 = vmatpush3.bf16.msra.mxu1 %v4426_v23  ;;  %v4487_v23 = vld [vmem:[%s6107_s1 + $0x300] ss:$12 sps:$4 sm:$0xff]  }
  0x4a   :  { %1842 = vmatmul.mubr.bf16.gmra.mrb[4].mxu0 %v4894_v51  ;;  %3787 = vmatprep.subr.bf16.mxu1 %v4433_v24  ;;  %v5133_v51 = vld [vmem:[%s6108_s0 + $0x14] ss:$36 sps:$4 sm:$0xff]   ;;  %v4496_v24 = vld [vmem:[%s6107_s1 + $0x31c] ss:$12 sps:$4 sm:$0xff]  }
  0x4b   :  { %1877 = vmatpush1.bf16.msra.mxu0 %v4396_v15  ;;  %1851 = vmatprep.mubr.bf16.mxu0 %v4906_v54  ;;  %v4472_v54 = vld [vmem:[%s6107_s1 + $0x548] ss:$12 sps:$4 sm:$0xff]   ;;  %v4503_v15 = vld [vmem:[%s6107_s1 + $0x5c0] ss:$12 sps:$4 sm:$0xff]  }
  0x4c   :  { %1878 = vmatprep.subr.bf16.mxu0 %v4405_v16  ;;  %2270 = vmatmul.mubr.bf16.gmra.mrb[20].mxu1 %v5042_v27  ;;  %v5238_v16 = vld [vmem:[%s6108_s0 + $0xec] ss:$36 sps:$4 sm:$0xff]  }
  0x4d   :  { %3788 = vmatpush3.bf16.msra.mxu1 %v4434_v28  ;;  %2277 = vmatprep.mubr.bf16.mxu1 %v5054_v30  ;;  %v4516_v28 = vld [vmem:[%s6107_s1 + $0x5f0] ss:$12 sps:$4 sm:$0xff]  }
  0x4e   :  { %3789 = vmatprep.subr.bf16.mxu1 %v4438_v29  ;;  %v4494_v29 = vld [vmem:[%s6107_s1 + $0x318] ss:$12 sps:$4 sm:$0xff]  }
  0x4f   :  { %1879 = vmatpush1.bf16.msra.mxu0 %v4403_v21  ;;  %v4504_v21 = vld [vmem:[%s6107_s1 + $0x500] ss:$12 sps:$4 sm:$0xff]  }
  0x50   :  { %1880 = vmatprep.subr.bf16.mxu0 %v4411_v22  ;;  %v4511_v22 = vld [vmem:[%s6107_s1 + $0x5d8] ss:$12 sps:$4 sm:$0xff]  }
  0x51   :  { %3790 = vmatpush3.bf16.msra.mxu1 %v4439_v33  ;;  %v4524_v33 = vld [vmem:[%s6107_s1 + $0x608] ss:$12 sps:$4 sm:$0xff]  }
  0x52   :  { %1852 = vmatmul.mubr.bf16.gmra.mrb[8].mxu0 %v4930_v61  ;;  %3791 = vmatprep.subr.bf16.mxu1 %v4446_v34  ;;  %v4455_v61 = vld [vmem:[%s6107_s1 + $0x288] ss:$12 sps:$4 sm:$0xff]   ;;  %v4500_v34 = vld [vmem:[%s6107_s1 + $0x330] ss:$12 sps:$4 sm:$0xff]  }
  0x53   :  { %1881 = vmatpush1.bf16.msra.mxu0 %v4409_v25  ;;  %1861 = vmatprep.mubr.bf16.mxu0 %v4942_v0  ;;  %v4485_v0 = vld [vmem:[%s6107_s1 + $0x578] ss:$12 sps:$4 sm:$0xff]   ;;  %v5262_v25 = vld [vmem:[%s6108_s0 + $0xe8] ss:$36 sps:$4 sm:$0xff]  }
  0x54   :  { %1882 = vmatprep.subr.bf16.mxu0 %v4419_v26  ;;  %2278 = vmatmul.mubr.bf16.gmra.mrb[24].mxu1 %v5080_v37  ;;  %v4512_v26 = vld [vmem:[%s6107_s1 + $0x518] ss:$12 sps:$4 sm:$0xff]  }
  0x55   :  { %3792 = vmatpush3.bf16.msra.mxu1 %v4447_v38  ;;  %2285 = vmatprep.mubr.bf16.mxu1 %v5092_v40  ;;  %v4528_v38 = vld [vmem:[%s6107_s1 + $0x620] ss:$12 sps:$4 sm:$0xff]  }
  0x56   :  { %3793 = vmatprep.subr.bf16.mxu1 %v4451_v39  ;;  %v4507_v39 = vld [vmem:[%s6107_s1 + $0x348] ss:$12 sps:$4 sm:$0xff]  }
  0x57   :  { %1883 = vmatpush1.bf16.msra.mxu0 %v4417_v31  ;;  %v5278_v31 = vld [vmem:[%s6108_s0 + $0x1c] ss:$36 sps:$4 sm:$0xff]  }
  0x58   :  { %1884 = vmatprep.subr.bf16.mxu0 %v4424_v32  ;;  %v4502_v32 = vld [vmem:[%s6107_s1 + $0x334] ss:$12 sps:$4 sm:$0xff]  }
  0x59   :  { %3794 = vmatpush3.bf16.msra.mxu1 %v4452_v43  ;;  %v4513_v43 = vld [vmem:[%s6107_s1 + $0x360] ss:$12 sps:$4 sm:$0xff]  }
  0x5a   :  { %1862 = vmatmul.mubr.bf16.gmra.mrb[12].mxu0 %v4966_v7  ;;  %3795 = vmatprep.subr.bf16.mxu1 %v4459_v44  ;;  %v4469_v7 = vld [vmem:[%s6107_s1 + $0x2b8] ss:$12 sps:$4 sm:$0xff]   ;;  %v4523_v44 = vld [vmem:[%s6107_s1 + $0x37c] ss:$12 sps:$4 sm:$0xff]  }
  0x5b   :  { %1885 = vmatpush1.bf16.msra.mxu0 %v4422_v35  ;;  %1904 = vmatprep.mubr.bf16.mxu0 %v4982_v11  ;;  %v4474_v11 = vld [vmem:[%s6107_s1 + $0x2d0] ss:$12 sps:$4 sm:$0xff]  }
  0x5c   :  { %1886 = vmatprep.subr.bf16.mxu0 %v4431_v36  ;;  %2286 = vmatmul.mubr.bf16.gmra.mrb[28].mxu1 %v5118_v47  ;;  %v5297_v35 = vld [vmem:[%s6108_s0 + $0x18] ss:$36 sps:$4 sm:$0xff]  }
  0x5d   :  { %3796 = vmatpush3.bf16.msra.mxu1 %v4460_v48  ;;  %2326 = vmatprep.mubr.bf16.mxu1 %v5133_v51  ;;  %v4509_v36 = vld [vmem:[%s6107_s1 + $0x34c] ss:$12 sps:$4 sm:$0xff]   ;;  %v4527_v48 = vld [vmem:[%s6107_s1 + $0x394] ss:$12 sps:$4 sm:$0xff]  }
  0x5e   :  { %3797 = vmatprep.subr.bf16.mxu1 %v4464_v49  ;;  %v4546_v49 = vld [vmem:[%s6107_s1 + $0x668] ss:$12 sps:$4 sm:$0xff]  }
  0x5f   :  { %1887 = vmatpush1.bf16.msra.mxu0 %v4429_v41  ;;  %v4515_v41 = vld [vmem:[%s6107_s1 + $0x364] ss:$12 sps:$4 sm:$0xff]  }
  0x60   :  { %1888 = vmatprep.subr.bf16.mxu0 %v4437_v42  ;;  %v4535_v42 = vld [vmem:[%s6107_s1 + $0x638] ss:$12 sps:$4 sm:$0xff]  }
  0x61   :  { %3798 = vmatpush3.bf16.msra.mxu1 %v4465_v53  ;;  %v4550_v53 = vld [vmem:[%s6107_s1 + $0x680] ss:$12 sps:$4 sm:$0xff]  }
  0x62   :  { %3823 = vmatprep.subr.bf16.mxu1 %v4472_v54  ;;  %v4531_v54 = vld [vmem:[%s6107_s1 + $0x3a8] ss:$12 sps:$4 sm:$0xff]  }
  0x63   :  { %1889 = vmatpush1.bf16.msra.mxu0 %v4435_v45  ;;  %v5340_v45 = vld [vmem:[%s6108_s0 + $0xac] ss:$36 sps:$4 sm:$0xff]  }
  0x64   :  { %1890 = vmatprep.subr.bf16.mxu0 %v4444_v46  ;;  %2327 = vmatmul.mubr.bf16.vlgmr.msra.gmra.mrb[32].mxu1 %v5154_v57  ;;  %v4521_v46 = vld [vmem:[%s6107_s1 + $0x378] ss:$12 sps:$4 sm:$0xff]  }
  0x65   :  { %3824 = vmatpush3.bf16.msra.mxu1 %v4473_v58  ;;  %2334 = vmatprep.mubr.bf16.mxu1 %v5166_v60  ;;  %v5393_v58 = vld [vmem:[%s6108_s0 + $0xf0] ss:$36 sps:$4 sm:$0xff]  }
  0x66   :  { %3825 = vmatprep.subr.bf16.mxu1 %v4477_v59  ;;  %v4544_v59 = vld [vmem:[%s6107_s1 + $0x3dc] ss:$12 sps:$4 sm:$0xff]  }
  0x67   :  { %1891 = vmatpush1.bf16.msra.mxu0 %v4442_v50  ;;  %v4525_v50 = vld [vmem:[%s6107_s1 + $0x390] ss:$12 sps:$4 sm:$0xff]  }
  0x68   :  { %1892 = vmatprep.subr.bf16.mxu0 %v4450_v52  ;;  %v4533_v52 = vld [vmem:[%s6107_s1 + $0x3ac] ss:$12 sps:$4 sm:$0xff]  }
  0x69   :  { %3826 = vmatpush3.bf16.msra.mxu1 %v4478_v63  ;;  %v4549_v63 = vld [vmem:[%s6107_s1 + $0x3f4] ss:$12 sps:$4 sm:$0xff]  }
  0x6a   :  { %3827 = vmatprep.subr.bf16.mxu1 %v4485_v0  ;;  %v5417_v0 = vld [vmem:[%s6108_s0 + $0x68] ss:$36 sps:$4 sm:$0xff]  }
  0x6b   :  { %1893 = vmatpush1.bf16.msra.mxu0 %v4448_v55  ;;  %v4538_v55 = vld [vmem:[%s6107_s1 + $0x3c4] ss:$12 sps:$4 sm:$0xff]  }
  0x6c   :  { %1894 = vmatprep.subr.bf16.mxu0 %v4457_v56  ;;  %2335 = vmatmul.mubr.bf16.gmra.mrb[36].mxu1 %v5190_v3  ;;  %v4557_v56 = vld [vmem:[%s6107_s1 + $0x698] ss:$12 sps:$4 sm:$0xff]  }
  0x6d   :  { %3828 = vmatpush3.bf16.msra.mxu1 %v4486_v4  ;;  %2342 = vmatprep.mubr.bf16.mxu1 %v5202_v6  ;;  %v4555_v4 = vld [vmem:[%s6107_s1 + $0x40c] ss:$12 sps:$4 sm:$0xff]  }
  0x6e   :  { %3829 = vmatprep.subr.bf16.mxu1 %v4490_v5  ;;  %v4553_v5 = vld [vmem:[%s6107_s1 + $0x408] ss:$12 sps:$4 sm:$0xff]  }
  0x6f   :  { %1895 = vmatpush1.bf16.msra.mxu0 %v4455_v61  ;;  %v4561_v61 = vld [vmem:[%s6107_s1 + $0x6b0] ss:$12 sps:$4 sm:$0xff]  }
  0x70   :  { %1896 = vmatprep.subr.bf16.mxu0 %v4463_v62  ;;  %v4542_v62 = vld [vmem:[%s6107_s1 + $0x3d8] ss:$12 sps:$4 sm:$0xff]  }
  0x71   :  { %3830 = vmatpush3.bf16.msra.mxu1 %v4491_v9  ;;  %v4558_v9 = vld [vmem:[%s6107_s1 + $0x420] ss:$12 sps:$4 sm:$0xff]  }
  0x72   :  { %3831 = vmatprep.subr.bf16.mxu1 %v4498_v10  ;;  %v4565_v10 = vld [vmem:[%s6107_s1 + $0x43c] ss:$12 sps:$4 sm:$0xff]  }
  0x73   :  { %1897 = vmatpush1.bf16.msra.mxu0 %v4461_v1  ;;  %v4547_v1 = vld [vmem:[%s6107_s1 + $0x3f0] ss:$12 sps:$4 sm:$0xff]  }
  0x74   :  { %1898 = vmatprep.subr.bf16.mxu0 %v4471_v2  ;;  %2343 = vmatmul.mubr.bf16.gmra.mrb[40].mxu1 %v5226_v13  ;;  %v5425_v2 = vld [vmem:[%s6108_s0 + $0xb0] ss:$36 sps:$4 sm:$0xff]  }
  0x75   :  { %3832 = vmatpush3.bf16.msra.mxu1 %v4499_v14  ;;  %2350 = vmatprep.mubr.bf16.mxu1 %v5238_v16  ;;  %v4567_v14 = vld [vmem:[%s6107_s1 + $0x450] ss:$12 sps:$4 sm:$0xff]  }
  0x76   :  { %3833 = vmatprep.subr.bf16.mxu1 %v4503_v15  ;;  %v4573_v15 = vld [vmem:[%s6107_s1 + $0x46c] ss:$12 sps:$4 sm:$0xff]  }
  0x77   :  { %1899 = vmatpush1.bf16.msra.mxu0 %v4469_v7  ;;  %v4560_v7 = vld [vmem:[%s6107_s1 + $0x424] ss:$12 sps:$4 sm:$0xff]  }
  0x78   :  { %1900 = vmatprep.subr.bf16.mxu0 %v4476_v8  ;;  %v5441_v8 = vld [vmem:[%s6108_s0 + $0xf8] ss:$36 sps:$4 sm:$0xff]  }
  0x79   :  { %3834 = vmatpush3.bf16.msra.mxu1 %v4504_v21  ;;  %v4575_v21 = vld [vmem:[%s6107_s1 + $0x480] ss:$12 sps:$4 sm:$0xff]  }
  0x7a   :  { %3835 = vmatprep.subr.bf16.mxu1 %v4511_v22  ;;  %v4580_v22 = vld [vmem:[%s6107_s1 + $0x49c] ss:$12 sps:$4 sm:$0xff]  }
  0x7b   :  { %1901 = vmatpush1.bf16.msra.mxu0 %v4474_v11  ;;  %v4563_v11 = vld [vmem:[%s6107_s1 + $0x438] ss:$12 sps:$4 sm:$0xff]  }
  0x7c   :  { %1902 = vmatprep.subr.bf16.mxu0 %v4483_v12  ;;  %2351 = vmatmul.mubr.bf16.gmra.mrb[44].mxu1 %v5262_v25  ;;  %v4569_v12 = vld [vmem:[%s6107_s1 + $0x454] ss:$12 sps:$4 sm:$0xff]  }
  0x7d   :  { %3836 = vmatpush3.bf16.msra.mxu1 %v4512_v26  ;;  %2391 = vmatprep.mubr.bf16.mxu1 %v5278_v31  ;;  %v4581_v26 = vld [vmem:[%s6107_s1 + $0x4b0] ss:$12 sps:$4 sm:$0xff]  }
  0x7e   :  { %3837 = vmatprep.subr.bf16.mxu1 %v4516_v28  ;;  %v4589_v28 = vld [vmem:[%s6107_s1 + $0x4e4] ss:$12 sps:$4 sm:$0xff]  }
  0x7f   :  { %1903 = vmatpush1.bf16.msra.mxu0 %v4481_v18  ;;  %v4571_v18 = vld [vmem:[%s6107_s1 + $0x468] ss:$12 sps:$4 sm:$0xff]  }
  0x80   :  { %1945 = vmatprep.subr.bf16.mxu0 %v4489_v19  ;;  %v4577_v19 = vld [vmem:[%s6107_s1 + $0x484] ss:$12 sps:$4 sm:$0xff]  }
  0x82   :  { %1905 = vmatmul.mubr.bf16.vlgmr.msra.gmra.mrb[0].mxu0 %v5004_v17  ;;  %v4517_v17 = vld [vmem:[%s6107_s1 + $0x530] ss:$12 sps:$4 sm:$0xff]  }
  0x83   :  { %1946 = vmatpush1.bf16.msra.mxu0 %v4487_v23  ;;  %1914 = vmatprep.mubr.bf16.mxu0 %v5016_v20  ;;  %v5308_v20 = vld [vmem:[%s6108_s0 + $0x64] ss:$36 sps:$4 sm:$0xff]  }
  0x84   :  { %1947 = vmatprep.subr.bf16.mxu0 %v4496_v24  ;;  %3838 = vmatpush3.bf16.msra.mxu1 %v4517_v17  ;;  %v4578_v23 = vld [vmem:[%s6107_s1 + $0x498] ss:$12 sps:$4 sm:$0xff]   ;;  %v4583_v24 = vld [vmem:[%s6107_s1 + $0x4b4] ss:$12 sps:$4 sm:$0xff]   ;;  %v4593_v17 = vld [vmem:[%s6107_s1 + $0x510] ss:$12 sps:$4 sm:$0xff]  }
  0x85   :  { %3955 = vmatprep.subr.bf16.mxu1 %v4524_v33 }
  0x87   :  { %1948 = vmatpush1.bf16.msra.mxu0 %v4494_v29  ;;  %2392 = vmatmul.mubr.bf16.vlgmr.msra.gmra.mrb[48].mxu1 %v5297_v35  ;;  %v4587_v29 = vld [vmem:[%s6107_s1 + $0x4e0] ss:$12 sps:$4 sm:$0xff]  }
  0x88   :  { %1949 = vmatprep.subr.bf16.mxu0 %v4502_v32  ;;  %3956 = vmatpush3.bf16.msra.mxu1 %v4524_v33  ;;  %v4595_v32 = vld [vmem:[%s6107_s1 + $0x514] ss:$12 sps:$4 sm:$0xff]   ;;  %v4601_v33 = vld [vmem:[%s6107_s1 + $0x544] ss:$12 sps:$4 sm:$0xff]  }
  0x89   :  { %3957 = vmatprep.subr.bf16.mxu1 %v4528_v38  ;;  %2399 = vmatprep.mubr.bf16.mxu1 %v5308_v20 }
  0x8a   :  { %1915 = vmatmul.mubr.bf16.gmra.mrb[4].mxu0 %v5042_v27  ;;  %v5326_v27 = vld [vmem:[%s6108_s0 + $0x60] ss:$36 sps:$4 sm:$0xff]  }
  0x8b   :  { %1950 = vmatpush1.bf16.msra.mxu0 %v4500_v34  ;;  %1924 = vmatprep.mubr.bf16.mxu0 %v5054_v30  ;;  %v4539_v30 = vld [vmem:[%s6107_s1 + $0x650] ss:$12 sps:$4 sm:$0xff]   ;;  %v4599_v34 = vld [vmem:[%s6107_s1 + $0x540] ss:$12 sps:$4 sm:$0xff]  }
  0x8c   :  { %1951 = vmatprep.subr.bf16.mxu0 %v4509_v36  ;;  %3958 = vmatpush3.bf16.msra.mxu1 %v4528_v38  ;;  %v4607_v36 = vld [vmem:[%s6107_s1 + $0x574] ss:$12 sps:$4 sm:$0xff]   ;;  %v4605_v38 = vld [vmem:[%s6107_s1 + $0x570] ss:$12 sps:$4 sm:$0xff]  }
  0x8d   :  { %3959 = vmatprep.subr.bf16.mxu1 %v4535_v42 }
  0x8f   :  { %1952 = vmatpush1.bf16.msra.mxu0 %v4507_v39  ;;  %2400 = vmatmul.mubr.bf16.gmra.mrb[52].mxu1 %v5326_v27  ;;  %v4610_v39 = vld [vmem:[%s6107_s1 + $0x58c] ss:$12 sps:$4 sm:$0xff]  }
  0x90   :  { %1953 = vmatprep.subr.bf16.mxu0 %v4515_v41  ;;  %3960 = vmatpush3.bf16.msra.mxu1 %v4535_v42  ;;  %v4608_v41 = vld [vmem:[%s6107_s1 + $0x588] ss:$12 sps:$4 sm:$0xff]   ;;  %v4613_v42 = vld [vmem:[%s6107_s1 + $0x5a4] ss:$12 sps:$4 sm:$0xff]  }
  0x91   :  { %3961 = vmatprep.subr.bf16.mxu1 %v4539_v30  ;;  %2407 = vmatprep.mubr.bf16.mxu1 %v5340_v45 }
  0x92   :  { %1925 = vmatmul.mubr.bf16.gmra.mrb[8].mxu0 %v5080_v37  ;;  %v5361_v37 = vld [vmem:[%s6108_s0 + $0xa8] ss:$36 sps:$4 sm:$0xff]  }
  0x93   :  { %1954 = vmatpush1.bf16.msra.mxu0 %v4513_v43  ;;  %1934 = vmatprep.mubr.bf16.mxu0 %v5092_v40  ;;  %v5372_v40 = vld [vmem:[%s6108_s0 + $0xf4] ss:$36 sps:$4 sm:$0xff]   ;;  %v4611_v43 = vld [vmem:[%s6107_s1 + $0x5a0] ss:$12 sps:$4 sm:$0xff]  }
  0x94   :  { %1955 = vmatprep.subr.bf16.mxu0 %v4523_v44  ;;  %3962 = vmatpush3.bf16.msra.mxu1 %v4539_v30  ;;  %v4616_v44 = vld [vmem:[%s6107_s1 + $0x5bc] ss:$12 sps:$4 sm:$0xff]   ;;  %v4614_v30 = vld [vmem:[%s6107_s1 + $0x5b8] ss:$12 sps:$4 sm:$0xff]  }
  0x95   :  { %3963 = vmatprep.subr.bf16.mxu1 %v4546_v49 }
  0x97   :  { %1956 = vmatpush1.bf16.msra.mxu0 %v4521_v46  ;;  %2408 = vmatmul.mubr.bf16.gmra.mrb[56].mxu1 %v5361_v37  ;;  %v4619_v46 = vld [vmem:[%s6107_s1 + $0x5d4] ss:$12 sps:$4 sm:$0xff]  }
  0x98   :  { %1957 = vmatprep.subr.bf16.mxu0 %v4527_v48  ;;  %3964 = vmatpush3.bf16.msra.mxu1 %v4546_v49  ;;  %v4617_v48 = vld [vmem:[%s6107_s1 + $0x5d0] ss:$12 sps:$4 sm:$0xff]   ;;  %v4622_v49 = vld [vmem:[%s6107_s1 + $0x5ec] ss:$12 sps:$4 sm:$0xff]  }
  0x99   :  { %3965 = vmatprep.subr.bf16.mxu1 %v4550_v53  ;;  %2415 = vmatprep.mubr.bf16.mxu1 %v5372_v40 }
  0x9a   :  { %1935 = vmatmul.mubr.bf16.gmra.mrb[12].mxu0 %v5118_v47  ;;  %v4536_v47 = vld [vmem:[%s6107_s1 + $0x3c0] ss:$12 sps:$4 sm:$0xff]  }
  0x9b   :  { %1958 = vmatpush1.bf16.msra.mxu0 %v4525_v50  ;;  %1977 = vmatprep.mubr.bf16.mxu0 %v5133_v51  ;;  %v5404_v51 = vld [vmem:[%s6108_s0 + $0x20] ss:$36 sps:$4 sm:$0xff]   ;;  %v4620_v50 = vld [vmem:[%s6107_s1 + $0x5e8] ss:$12 sps:$4 sm:$0xff]  }
  0x9c   :  { %1959 = vmatprep.subr.bf16.mxu0 %v4533_v52  ;;  %3966 = vmatpush3.bf16.msra.mxu1 %v4550_v53  ;;  %v4625_v52 = vld [vmem:[%s6107_s1 + $0x604] ss:$12 sps:$4 sm:$0xff]  }
  0x9d   :  { %3967 = vmatprep.subr.bf16.mxu1 %v4557_v56 }
  0x9f   :  { %1960 = vmatpush1.bf16.msra.mxu0 %v4531_v54  ;;  %2416 = vmatmul.mubr.bf16.gmra.mrb[60].mxu1 %v5393_v58 }
  0xa0   :  { %1961 = vmatprep.subr.bf16.mxu0 %v4538_v55  ;;  %3968 = vmatpush3.bf16.msra.mxu1 %v4557_v56  ;;  %v4623_v55 = vld [vmem:[%s6107_s1 + $0x600] ss:$12 sps:$4 sm:$0xff]  }
  0xa1   :  { %3969 = vmatprep.subr.bf16.mxu1 %v4561_v61  ;;  %3971 = vmatprep.mubr.bf16.mxu1 %v5404_v51 }
  0xa3   :  { %1962 = vmatpush1.bf16.msra.mxu0 %v4536_v47 }
  0xa4   :  { %1963 = vmatprep.subr.bf16.mxu0 %v4544_v59  ;;  %3970 = vmatpush3.bf16.msra.mxu1 %v4561_v61  ;;  %v4628_v59 = vld [vmem:[%s6107_s1 + $0x61c] ss:$12 sps:$4 sm:$0xff]  }
  0xa7   :  { %1964 = vmatpush1.bf16.msra.mxu0 %v4542_v62  ;;  %3972 = vmatmul.mubr.bf16.vlgmr.msra.gmra.mrb[64].mxu1 %v5417_v0 }
  0xa8   :  { %1965 = vmatprep.subr.bf16.mxu0 %v4549_v63  ;;  %3975 = vmatprep.mubr.bf16.mxu1 %v5425_v2  ;;  %v4626_v63 = vld [vmem:[%s6107_s1 + $0x618] ss:$12 sps:$4 sm:$0xff]  }
  0xab   :  { %1966 = vmatpush1.bf16.msra.mxu0 %v4547_v1  ;;  %v4631_v1 = vld [vmem:[%s6107_s1 + $0x634] ss:$12 sps:$4 sm:$0xff]  }
  0xac   :  { %1967 = vmatprep.subr.bf16.mxu0 %v4555_v4 }
  0xaf   :  { %1968 = vmatpush1.bf16.msra.mxu0 %v4553_v5  ;;  %3976 = vmatmul.mubr.bf16.gmra.mrb[68].mxu1 %v5441_v8 }
  0xb0   :  { %1969 = vmatprep.subr.bf16.mxu0 %v4560_v7  ;;  %v4629_v7 = vld [vmem:[%s6107_s1 + $0x630] ss:$12 sps:$4 sm:$0xff]  }
  0xb3   :  { %1970 = vmatpush1.bf16.msra.mxu0 %v4558_v9 }
  0xb4   :  { %1971 = vmatprep.subr.bf16.mxu0 %v4565_v10  ;;  %v4634_v10 = vld [vmem:[%s6107_s1 + $0x64c] ss:$12 sps:$4 sm:$0xff]  }
  0xb7   :  { %1972 = vmatpush1.bf16.msra.mxu0 %v4563_v11 }
  0xb8   :  { %1973 = vmatprep.subr.bf16.mxu0 %v4569_v12  ;;  %v4632_v12 = vld [vmem:[%s6107_s1 + $0x648] ss:$12 sps:$4 sm:$0xff]  }
  0xbb   :  { %1974 = vmatpush1.bf16.msra.mxu0 %v4567_v14  ;;  %v4637_v14 = vld [vmem:[%s6107_s1 + $0x664] ss:$12 sps:$4 sm:$0xff]  }
  0xbc   :  { %1975 = vmatprep.subr.bf16.mxu0 %v4573_v15 }
  0xbf   :  { %1976 = vmatpush1.bf16.msra.mxu0 %v4571_v18 }
  0xc0   :  { %2018 = vmatprep.subr.bf16.mxu0 %v4577_v19  ;;  %v4635_v19 = vld [vmem:[%s6107_s1 + $0x660] ss:$12 sps:$4 sm:$0xff]  }
  0xc2   :  { %1978 = vmatmul.mubr.bf16.vlgmr.msra.gmra.mrb[0].mxu0 %v5154_v57  ;;  %v4586_v57 = vld [vmem:[%s6107_s1 + $0x4cc] ss:$12 sps:$4 sm:$0xff]  }
  0xc3   :  { %2019 = vmatpush1.bf16.msra.mxu0 %v4575_v21  ;;  %1987 = vmatprep.mubr.bf16.mxu0 %v5166_v60  ;;  %v4584_v60 = vld [vmem:[%s6107_s1 + $0x4c8] ss:$12 sps:$4 sm:$0xff]  }
  0xc4   :  { %2020 = vmatprep.subr.bf16.mxu0 %v4580_v22  ;;  %v4640_v22 = vld [vmem:[%s6107_s1 + $0x67c] ss:$12 sps:$4 sm:$0xff]  }
  0xc7   :  { %2021 = vmatpush1.bf16.msra.mxu0 %v4578_v23 }
  0xc8   :  { %2022 = vmatprep.subr.bf16.mxu0 %v4583_v24  ;;  %v4638_v24 = vld [vmem:[%s6107_s1 + $0x678] ss:$12 sps:$4 sm:$0xff]  }
  0xca   :  { %1988 = vmatmul.mubr.bf16.gmra.mrb[4].mxu0 %v5190_v3  ;;  %v4592_v3 = vld [vmem:[%s6107_s1 + $0x4fc] ss:$12 sps:$4 sm:$0xff]  }
  0xcb   :  { %2023 = vmatpush1.bf16.msra.mxu0 %v4581_v26  ;;  %1997 = vmatprep.mubr.bf16.mxu0 %v5202_v6  ;;  %v4590_v6 = vld [vmem:[%s6107_s1 + $0x4f8] ss:$12 sps:$4 sm:$0xff]   ;;  %v4643_v26 = vld [vmem:[%s6107_s1 + $0x694] ss:$12 sps:$4 sm:$0xff]  }
  0xcc   :  { %2024 = vmatprep.subr.bf16.mxu0 %v4586_v57 }
  0xcf   :  { %2025 = vmatpush1.bf16.msra.mxu0 %v4584_v60 }
  0xd0   :  { %2026 = vmatprep.subr.bf16.mxu0 %v4589_v28  ;;  %v4641_v28 = vld [vmem:[%s6107_s1 + $0x690] ss:$12 sps:$4 sm:$0xff]  }
  0xd2   :  { %1998 = vmatmul.mubr.bf16.gmra.mrb[8].mxu0 %v5226_v13  ;;  %v4598_v13 = vld [vmem:[%s6107_s1 + $0x52c] ss:$12 sps:$4 sm:$0xff]  }
  0xd3   :  { %2027 = vmatpush1.bf16.msra.mxu0 %v4587_v29  ;;  %2007 = vmatprep.mubr.bf16.mxu0 %v5238_v16  ;;  %v4596_v16 = vld [vmem:[%s6107_s1 + $0x528] ss:$12 sps:$4 sm:$0xff]  }
  0xd4   :  { %2028 = vmatprep.subr.bf16.mxu0 %v4592_v3  ;;  %v4646_v3 = vld [vmem:[%s6107_s1 + $0x6ac] ss:$12 sps:$4 sm:$0xff]  }
  0xd7   :  { %2029 = vmatpush1.bf16.msra.mxu0 %v4590_v6 }
  0xd8   :  { %2030 = vmatprep.subr.bf16.mxu0 %v4595_v32  ;;  %v4644_v32 = vld [vmem:[%s6107_s1 + $0x6a8] ss:$12 sps:$4 sm:$0xff]  }
  0xda   :  { %2008 = vmatmul.mubr.bf16.gmra.mrb[12].mxu0 %v5262_v25  ;;  %v4604_v25 = vld [vmem:[%s6107_s1 + $0x55c] ss:$12 sps:$4 sm:$0xff]  }
  0xdb   :  { %2031 = vmatpush1.bf16.msra.mxu0 %v4593_v17  ;;  %2050 = vmatprep.mubr.bf16.mxu0 %v5278_v31  ;;  %v4602_v31 = vld [vmem:[%s6107_s1 + $0x558] ss:$12 sps:$4 sm:$0xff]   ;;  %v4683_v17 = vmov 0  }
  0xdc   :  { %2032 = vmatprep.subr.bf16.mxu0 %v4598_v13 }
  0xdf   :  { %2033 = vmatpush1.bf16.msra.mxu0 %v4596_v16 }
  0xe0   :  { %2034 = vmatprep.subr.bf16.mxu0 %v4601_v33 }
  0xe3   :  { %2035 = vmatpush1.bf16.msra.mxu0 %v4599_v34 }
  0xe4   :  { %2036 = vmatprep.subr.bf16.mxu0 %v4604_v25 }
  0xe7   :  { %2037 = vmatpush1.bf16.msra.mxu0 %v4602_v31 }
  0xe8   :  { %2038 = vmatprep.subr.bf16.mxu0 %v4607_v36 }
  0xeb   :  { %2039 = vmatpush1.bf16.msra.mxu0 %v4605_v38 }
  0xec   :  { %2040 = vmatprep.subr.bf16.mxu0 %v4610_v39 }
  0xef   :  { %2041 = vmatpush1.bf16.msra.mxu0 %v4608_v41 }
  0xf0   :  { %2042 = vmatprep.subr.bf16.mxu0 %v4613_v42 }
  0xf3   :  { %2043 = vmatpush1.bf16.msra.mxu0 %v4611_v43 }
  0xf4   :  { %2044 = vmatprep.subr.bf16.mxu0 %v4616_v44 }
  0xf7   :  { %2045 = vmatpush1.bf16.msra.mxu0 %v4614_v30  ;;  %v3719_v53 = vpop.f32.mrb[0].mxu1 }
  0xf8   :  { %2046 = vmatprep.subr.bf16.mxu0 %v4619_v46  ;;  %v3720_v54 = vpop.f32.mrb[1].mxu1 }
  0xf9   :  { %v5575_v56 = vadd.f32 %v3720_v54, %v3719_v53  ;;  %v3722_v47 = vpop.f32.mrb[2].mxu1 }
  0xfa   :  { %v3723_v61 = vpop.f32.mrb[3].mxu1 }
  0xfb   :  { %2047 = vmatpush1.bf16.msra.mxu0 %v4617_v48  ;;  %v5580_v62 = vadd.f32 %v3723_v61, %v3722_v47 }
  0xfc   :  { %2048 = vmatprep.subr.bf16.mxu0 %v4622_v49 }
  0xff   :  { %2049 = vmatpush1.bf16.msra.mxu0 %v4620_v50  ;;  %v3725_v4 = vpop.f32.mrb[4].mxu1 }
 0x100   :  { %2091 = vmatprep.subr.bf16.mxu0 %v4625_v52  ;;  %v3726_v5 = vpop.f32.mrb[5].mxu1 }
 0x101   :  { %v3728_v9 = vpop.f32.mrb[6].mxu1 }
 0x102   :  { %2051 = vmatmul.mubr.bf16.vlgmr.msra.gmra.mrb[0].mxu0 %v5297_v35  ;;  %v3727_v35 = vadd.f32 %v3726_v5, %v3725_v4 }
 0x103   :  { %2092 = vmatpush1.bf16.msra.mxu0 %v4623_v55  ;;  %2060 = vmatprep.mubr.bf16.mxu0 %v5308_v20  ;;  %v3729_v20 = vpop.f32.mrb[7].mxu1 }
 0x104   :  { %2093 = vmatprep.subr.bf16.mxu0 %v4628_v59  ;;  %v3730_v11 = vadd.f32 %v3729_v20, %v3728_v9 }
 0x107   :  { %2094 = vmatpush1.bf16.msra.mxu0 %v4626_v63  ;;  %v3731_v15 = vpop.f32.mrb[8].mxu1 }
 0x108   :  { %2095 = vmatprep.subr.bf16.mxu0 %v4631_v1  ;;  %v3732_v18 = vpop.f32.mrb[9].mxu1 }
 0x109   :  { %v3734_v21 = vpop.f32.mrb[10].mxu1 }
 0x10a   :  { %2061 = vmatmul.mubr.bf16.gmra.mrb[4].mxu0 %v5326_v27  ;;  %v3733_v27 = vadd.f32 %v3732_v18, %v3731_v15 }
 0x10b   :  { %2096 = vmatpush1.bf16.msra.mxu0 %v4629_v7  ;;  %2070 = vmatprep.mubr.bf16.mxu0 %v5340_v45  ;;  %v3735_v45 = vpop.f32.mrb[11].mxu1 }
 0x10c   :  { %2097 = vmatprep.subr.bf16.mxu0 %v4634_v10  ;;  %v3736_v23 = vadd.f32 %v3735_v45, %v3734_v21 }
 0x10f   :  { %2098 = vmatpush1.bf16.msra.mxu0 %v4632_v12  ;;  %v3737_v57 = vpop.f32.mrb[12].mxu1 }
 0x110   :  { %2099 = vmatprep.subr.bf16.mxu0 %v4637_v14  ;;  %v3738_v60 = vpop.f32.mrb[13].mxu1 }
 0x111   :  { %v3740_v29 = vpop.f32.mrb[14].mxu1 }
 0x112   :  { %2071 = vmatmul.mubr.bf16.gmra.mrb[8].mxu0 %v5361_v37  ;;  %v3739_v37 = vadd.f32 %v3738_v60, %v3737_v57 }
 0x113   :  { %2100 = vmatpush1.bf16.msra.mxu0 %v4635_v19  ;;  %2080 = vmatprep.mubr.bf16.mxu0 %v5372_v40  ;;  %v3741_v40 = vpop.f32.mrb[15].mxu1 }
 0x114   :  { %2101 = vmatprep.subr.bf16.mxu0 %v4640_v22  ;;  %v3742_v6 = vadd.f32 %v3741_v40, %v3740_v29 }
 0x117   :  { %2102 = vmatpush1.bf16.msra.mxu0 %v4638_v24  ;;  %v3759_v13 = vpop.f32.mrb[16].mxu1 }
 0x118   :  { %2103 = vmatprep.subr.bf16.mxu0 %v4643_v26  ;;  %v3760_v16 = vpop.f32.mrb[17].mxu1 }
 0x119   :  { %v3761_v33 = vadd.f32 %v3760_v16, %v3759_v13  ;;  %v3762_v34 = vpop.f32.mrb[18].mxu1 }
 0x11a   :  { %2081 = vmatmul.mubr.bf16.gmra.mrb[12].mxu0 %v5393_v58  ;;  %v3763_v25 = vpop.f32.mrb[19].mxu1 }
 0x11b   :  { %2104 = vmatpush1.bf16.msra.mxu0 %v4641_v28  ;;  %2123 = vmatprep.mubr.bf16.mxu0 %v4683_v17  ;;  %v2264_v31 = vadd.f32 %v3761_v33, %v5575_v56  ;;  %v3764_v36 = vadd.f32 %v3763_v25, %v3762_v34 }
 0x11c   :  { %2105 = vmatprep.subr.bf16.mxu0 %v4646_v3 }
 0x11d   :  { %v2267_v58 = vadd.f32 %v3764_v36, %v5580_v62 }
 0x11f   :  { %2106 = vmatpush1.bf16.msra.mxu0 %v4644_v32  ;;  %v3765_v38 = vpop.f32.mrb[20].mxu1 }
 0x120   :  { %v3766_v39 = vpop.f32.mrb[21].mxu1 }
 0x121   :  { %v3767_v41 = vadd.f32 %v3766_v39, %v3765_v38  ;;  %v3768_v42 = vpop.f32.mrb[22].mxu1 }
 0x122   :  { %2124 = vmatmul.mubr.bf16.vlgmr.msra.gmra.mrb[0].mxu0 %v5404_v51  ;;  %v3769_v43 = vpop.f32.mrb[23].mxu1 }
 0x123   :  { %2133 = vmatprep.mubr.bf16.mxu0 %v4683_v17  ;;  %v2272_v44 = vadd.f32 %v3767_v41, %v3727_v35  ;;  %v3770_v30 = vadd.f32 %v3769_v43, %v3768_v42 }
 0x125   :  { %v2275_v46 = vadd.f32 %v3770_v30, %v3730_v11 }
 0x127   :  { %v3771_v48 = vpop.f32.mrb[24].mxu1 }
 0x128   :  { %v3772_v49 = vpop.f32.mrb[25].mxu1 }
 0x129   :  { %v3773_v50 = vadd.f32 %v3772_v49, %v3771_v48  ;;  %v3774_v51 = vpop.f32.mrb[26].mxu1 }
 0x12a   :  { %2134 = vmatmul.mubr.bf16.gmra.mrb[4].mxu0 %v5417_v0  ;;  %v3775_v52 = vpop.f32.mrb[27].mxu1 }
 0x12b   :  { %2143 = vmatprep.mubr.bf16.mxu0 %v4683_v17  ;;  %v2280_v53 = vadd.f32 %v3773_v50, %v3733_v27  ;;  %v3776_v54 = vadd.f32 %v3775_v52, %v3774_v51 }
 0x12d   :  { %v2283_v55 = vadd.f32 %v3776_v54, %v3736_v23 }
 0x12f   :  { %v3777_v56 = vpop.f32.mrb[28].mxu1 }
 0x130   :  { %v3778_v47 = vpop.f32.mrb[29].mxu1 }
 0x131   :  { %v3779_v59 = vadd.f32 %v3778_v47, %v3777_v56  ;;  %v3780_v61 = vpop.f32.mrb[30].mxu1 }
 0x132   :  { %2144 = vmatmul.mubr.bf16.gmra.mrb[8].mxu0 %v5425_v2  ;;  %v3781_v0 = vpop.f32.mrb[31].mxu1 }
 0x133   :  { %2153 = vmatprep.mubr.bf16.mxu0 %v4683_v17  ;;  %v2288_v62 = vadd.f32 %v3779_v59, %v3739_v37  ;;  %v3782_v63 = vadd.f32 %v3781_v0, %v3780_v61 }
 0x135   :  { %v2291_v1 = vadd.f32 %v3782_v63, %v3742_v6 }
 0x137   :  { %v3799_v4 = vpop.f32.mrb[32].mxu1 }
 0x138   :  { %v3800_v5 = vpop.f32.mrb[33].mxu1 }
 0x139   :  { %v3801_v7 = vadd.f32 %v3800_v5, %v3799_v4  ;;  %v3802_v35 = vpop.f32.mrb[34].mxu1  ;;  %v30_v5 = vlaneseq }
 0x13a   :  { %2154 = vmatmul.mubr.bf16.gmra.mrb[12].mxu0 %v5441_v8  ;;  %v3803_v9 = vpop.f32.mrb[35].mxu1 }
 0x13b   :  { %v2329_v10 = vadd.f32 %v3801_v7, %v2264_v31  ;;  %v3804_v2 = vadd.f32 %v3803_v9, %v3802_v35 }
 0x13d   :  { %v2332_v20 = vadd.f32 %v3804_v2, %v2267_v58 }
 0x13f   :  { %v3805_v11 = vpop.f32.mrb[36].mxu1 }
 0x140   :  { %v3806_v12 = vpop.f32.mrb[37].mxu1 }
 0x141   :  { %v3807_v14 = vadd.f32 %v3806_v12, %v3805_v11  ;;  %v3808_v15 = vpop.f32.mrb[38].mxu1  ;;  %v5638_v11 = vshrl.u32 %v30_v5, 7 }
 0x142   :  { %v3809_v18 = vpop.f32.mrb[39].mxu1 }
 0x143   :  { %v2337_v19 = vadd.f32 %v3807_v14, %v2272_v44  ;;  %v3810_v27 = vadd.f32 %v3809_v18, %v3808_v15  ;;  %vm2538_vm0 = vcmp.lt.s32.totalorder %v5638_v11, 7  ;;  %vm2505_vm2 = vcmp.lt.s32.totalorder %v5638_v11, 1 }
 0x145   :  { %v2340_v21 = vadd.f32 %v3810_v27, %v2275_v46 }
 0x147   :  { %v3811_v22 = vpop.f32.mrb[40].mxu1 }
 0x148   :  { %v3812_v45 = vpop.f32.mrb[41].mxu1 }
 0x149   :  { %v3813_v8 = vadd.f32 %v3812_v45, %v3811_v22  ;;  %v3814_v23 = vpop.f32.mrb[42].mxu1 }
 0x14a   :  { %v3815_v24 = vpop.f32.mrb[43].mxu1 }
 0x14b   :  { %v2345_v26 = vadd.f32 %v3813_v8, %v2280_v53  ;;  %v3816_v57 = vadd.f32 %v3815_v24, %v3814_v23 }
 0x14d   :  { %v2348_v60 = vadd.f32 %v3816_v57, %v2283_v55 }
 0x14f   :  { %v3817_v28 = vpop.f32.mrb[44].mxu1 }
 0x150   :  { %v3818_v37 = vpop.f32.mrb[45].mxu1 }
 0x151   :  { %v3819_v29 = vadd.f32 %v3818_v37, %v3817_v28  ;;  %v3820_v3 = vpop.f32.mrb[46].mxu1 }
 0x152   :  { %v3821_v40 = vpop.f32.mrb[47].mxu1 }
 0x153   :  { %v2353_v6 = vadd.f32 %v3819_v29, %v2288_v62  ;;  %v3822_v32 = vadd.f32 %v3821_v40, %v3820_v3 }
 0x155   :  { %v2356_v13 = vadd.f32 %v3822_v32, %v2291_v1 }
 0x15a   :  { %v3839_v16 = vpop.f32.mrb[48].mxu1 }
 0x15b   :  { %v3840_v33 = vpop.f32.mrb[49].mxu1 }
 0x15c   :  { %v3841_v34 = vadd.f32 %v3840_v33, %v3839_v16  ;;  %v3842_v25 = vpop.f32.mrb[50].mxu1 }
 0x15d   :  { %v3843_v31 = vpop.f32.mrb[51].mxu1 }
 0x15e   :  { %v3844_v36 = vadd.f32 %v3843_v31, %v3842_v25  ;;  %v2394_v58 = vadd.f32 %v3841_v34, %v2329_v10  ;;  %v2584_v25 = vld [vmem:[%s6109_s3] sm:$0xff]  ;;  %v2585_v31 = vld [vmem:[%s6109_s3 + $0x8] sm:$0xff] }
 0x160   :  { %v2397_v38 = vadd.f32 %v3844_v36, %v2332_v20  ;;  %v5679_v36 = vpack.c.bf16 %v2585_v31, %v2584_v25 }
 0x162   :  { %v3845_v39 = vpop.f32.mrb[52].mxu1 }
 0x163   :  { %v3846_v41 = vpop.f32.mrb[53].mxu1 }
 0x164   :  { %v3847_v42 = vadd.f32 %v3846_v41, %v3845_v39  ;;  %v3848_v43 = vpop.f32.mrb[54].mxu1  ;;  %v2587_v39 = vld [vmem:[%s6109_s3 + $0x18] sm:$0xff] }
 0x165   :  { %v3849_v44 = vpop.f32.mrb[55].mxu1 }
 0x166   :  { %v3850_v30 = vadd.f32 %v3849_v44, %v3848_v43  ;;  %v2402_v46 = vadd.f32 %v3847_v42, %v2337_v19  ;;  %v2588_v42 = vld [vmem:[%s6109_s3 + $0x20] sm:$0xff]  ;;  %v2589_v43 = vld [vmem:[%s6109_s3 + $0x28] sm:$0xff] }
 0x167   :  { %v5705_v44 = vpack.c.bf16 %v2589_v43, %v2588_v42 }
 0x168   :  { %v2405_v48 = vadd.f32 %v3850_v30, %v2340_v21  ;;  %v2590_v30 = vld [vmem:[%s6109_s3 + $0x30] sm:$0xff] }
 0x16a   :  { %v3851_v49 = vpop.f32.mrb[56].mxu1 }
 0x16b   :  { %v3852_v50 = vpop.f32.mrb[57].mxu1 }
 0x16c   :  { %v3853_v51 = vadd.f32 %v3852_v50, %v3851_v49  ;;  %v3854_v52 = vpop.f32.mrb[58].mxu1  ;;  %v2592_v49 = vld [vmem:[%s6109_s3 + $0x40] sm:$0xff]  ;;  %v2593_v50 = vld [vmem:[%s6109_s3 + $0x48] sm:$0xff] }
 0x16d   :  { %v3855_v53 = vpop.f32.mrb[59].mxu1 }
 0x16e   :  { %v3856_v54 = vadd.f32 %v3855_v53, %v3854_v52  ;;  %v2410_v55 = vadd.f32 %v3853_v51, %v2345_v26  ;;  %v5729_v51 = vpack.c.bf16 %v2593_v50, %v2592_v49  ;;  %v2594_v52 = vld [vmem:[%s6109_s3 + $0x50] sm:$0xff]  ;;  %v2595_v53 = vld [vmem:[%s6109_s3 + $0x58] sm:$0xff] }
 0x170   :  { %v2413_v56 = vadd.f32 %v3856_v54, %v2348_v60  ;;  %v5741_v54 = vpack.c.bf16 %v2595_v53, %v2594_v52  ;;  %v43_v52 = vand.u32 31, %v5638_v11 }
 0x172   :  { %v3857_v47 = vpop.f32.mrb[60].mxu1  ;;  %vm5818_vm5 = vcmp.gt.s32.totalorder %v43_v52, 0 }
 0x173   :  { %v3858_v59 = vpop.f32.mrb[61].mxu1 }
 0x174   :  { %v3859_v61 = vadd.f32 %v3858_v59, %v3857_v47  ;;  %v3860_v0 = vpop.f32.mrb[62].mxu1  ;;  %v2598_v59 = vld [vmem:[%s6109_s3 + $0x70] sm:$0xff] }
 0x175   :  { %v3861_v62 = vpop.f32.mrb[63].mxu1 }
 0x176   :  { %v3862_v63 = vadd.f32 %v3861_v62, %v3860_v0  ;;  %v2418_v1 = vadd.f32 %v3859_v61, %v2353_v6  ;;  %v2599_v61 = vld [vmem:[%s6109_s3 + $0x78] sm:$0xff]  ;;  %v4686_v62 = vmov 0.0  }
 0x177   :  { %v5765_v0 = vpack.c.bf16 %v2599_v61, %v2598_v59  ;;  %4011 = vmatprep.mubr.msk.f32.mxu1 %vm4685_vm1, %v4686_v62  ;;  %4105 = vmatprep.mubr.msk.f32.mxu0 %vm4685_vm1, %v4686_v62 }
 0x178   :  { %v2421_v4 = vadd.f32 %v3862_v63, %v2356_v13 }
 0x17a   :  { %v3973_v7 = vpop.f32.mrb[64].mxu1 }
 0x17b   :  { %v2467_v35 = vadd.f32 %v3973_v7, %v2402_v46  ;;  %v2458_v9 = vpop.f32.mrb[65].mxu1  ;;  %v2591_v46 = vld [vmem:[%s6109_s3 + $0x38] sm:$0xff] }
 0x17c   :  { %v2459_v10 = vadd.f32 %v2458_v9, %v2394_v58  ;;  %v3974_v2 = vpop.f32.mrb[66].mxu1  ;;  %v4684_v58 = vmov 0.0|0.0   ;;  %v34_v9 = vadd.s32 24, %v5638_v11 }
 0x17d   :  { %v2470_v20 = vadd.f32 %v3974_v2, %v2405_v48  ;;  %v2461_v12 = vpop.f32.mrb[67].mxu1  ;;  %v2532_v14 = vrot.slane %v2467_v35, 1  ;;  %4143 = vmatprep.subr.bf16.mxu1 %v4684_v58  ;;  %4191 = vmatprep.subr.bf16.mxu0 %v4684_v58  ;;  %v5717_v48 = vpack.c.bf16 %v2591_v46, %v2590_v30 }
 0x17e   :  { %v2530_v15 = vrot.slane %v2459_v10, 1  ;;  %v2462_v18 = vadd.f32 %v2461_v12, %v2397_v38  ;;  %4145 = vmatpush3.bf16.msra.mxu1 %v5679_v36  ;;  %4193 = vmatpush3.bf16.msra.mxu0 %v5679_v36  ;;  %v2586_v38 = vld [vmem:[%s6109_s3 + $0x10] sm:$0xff] }
 0x17f   :  { %v2533_v19 = vrot.slane %v2470_v20, 1  ;;  %4146 = vmatprep.subr.bf16.mxu1 %v4684_v58  ;;  %4194 = vmatprep.subr.bf16.mxu0 %v4684_v58  ;;  %v5693_v41 = vpack.c.bf16 %v2587_v39, %v2586_v38 }
 0x180   :  { %v2531_v27 = vrot.slane %v2462_v18, 1 }
 0x181   :  { %v5643_v21 = vsel %vm2538_vm0, %v2532_v14, %v2533_v19 }
 0x182   :  { %v5647_v22 = vsel %vm2538_vm0, %v2530_v15, %v2531_v27  ;;  %v3977_v45 = vpop.f32.mrb[68].mxu1  ;;  %v5651_v8 = vsel %vm2538_vm0, %v2531_v27, %v2532_v14  ;;  %4148 = vmatpush3.bf16.msra.mxu1 %v5693_v41  ;;  %4196 = vmatpush3.bf16.msra.mxu0 %v5693_v41  ;;  %v64_v14 = vand.u32 31, %v34_v9 }
 0x183   :  { %v2483_v23 = vadd.f32 %v3977_v45, %v2418_v1  ;;  %v2474_v24 = vpop.f32.mrb[69].mxu1  ;;  %4149 = vmatprep.subr.bf16.mxu1 %v4684_v58  ;;  %4197 = vmatprep.subr.bf16.mxu0 %v4684_v58 }
 0x184   :  { %v2475_v26 = vadd.f32 %v2474_v24, %v2410_v55  ;;  %v3978_v57 = vpop.f32.mrb[70].mxu1  ;;  %v2596_v55 = vld [vmem:[%s6109_s3 + $0x60] sm:$0xff]  ;;  %vm5784_vm3 = vcmp.lt.s32.totalorder %v64_v14, 31 }
 0x185   :  { %v2486_v60 = vadd.f32 %v3978_v57, %v2421_v4  ;;  %v2477_v28 = vpop.f32.mrb[71].mxu1  ;;  %v2536_v37 = vrot.slane %v2483_v23, 1 }
 0x186   :  { %v2534_v29 = vrot.slane %v2475_v26, 1  ;;  %v2478_v3 = vadd.f32 %v2477_v28, %v2413_v56  ;;  %4151 = vmatpush3.bf16.msra.mxu1 %v5705_v44  ;;  %4199 = vmatpush3.bf16.msra.mxu0 %v5705_v44  ;;  %v2597_v56 = vld [vmem:[%s6109_s3 + $0x68] sm:$0xff] }
 0x187   :  { %v2537_v40 = vrot.slane %v2486_v60, 1  ;;  %4152 = vmatprep.subr.bf16.mxu1 %v4684_v58  ;;  %4200 = vmatprep.subr.bf16.mxu0 %v4684_v58  ;;  %v5753_v47 = vpack.c.bf16 %v2597_v56, %v2596_v55 }
 0x188   :  { %v2535_v6 = vrot.slane %v2478_v3, 1  ;;  %v5655_v32 = vsel %vm2538_vm0, %v2533_v19, %v2534_v29  ;;  %v35_v19 = vadd.s32 32, %v5638_v11 }
 0x189   :  { %v5659_v13 = vsel %vm2538_vm0, %v2536_v37, %v2537_v40  ;;  %v5663_v16 = vsel %vm2538_vm0, %v2537_v40, %v2530_v15 }
 0x18a   :  { %v5667_v33 = vsel %vm2538_vm0, %v2534_v29, %v2535_v6  ;;  %v5671_v34 = vsel %vm2538_vm0, %v2535_v6, %v2536_v37  ;;  %4154 = vmatpush3.bf16.msra.mxu1 %v5717_v48  ;;  %4202 = vmatpush3.bf16.msra.mxu0 %v5717_v48  ;;  %v71_v60 = vand.u32 31, %v35_v19  ;;  %v2550_v29 = vsel %vm5784_vm3, %v5655_v32, 0.0 }
 0x18b   :  { %4155 = vmatprep.subr.bf16.mxu1 %v4684_v58  ;;  %4203 = vmatprep.subr.bf16.mxu0 %v4684_v58  ;;  %v38_v32 = vadd.s32 56, %v5638_v11 }
 0x18c   :  { %vm5798_vm4 = vcmp.gt.s32.totalorder %v71_v60, 0 }
 0x18d   :  { %v92_v56 = vand.u32 31, %v38_v32 }
 0x18e   :  { %4157 = vmatpush3.bf16.msra.mxu1 %v5729_v51  ;;  %4205 = vmatpush3.bf16.msra.mxu0 %v5729_v51 }
 0x18f   :  { %4158 = vmatprep.subr.bf16.mxu1 %v4684_v58  ;;  %4206 = vmatprep.subr.bf16.mxu0 %v4684_v58  ;;  %vm5822_vm6 = vcmp.lt.s32.totalorder %v92_v56, 31 }
 0x190   :  { %v2554_v19 = vsel %vm5822_vm6, %v5663_v16, 0.0 }
 0x192   :  { %4160 = vmatpush3.bf16.msra.mxu1 %v5741_v54  ;;  %4208 = vmatpush3.bf16.msra.mxu0 %v5741_v54 }
 0x193   :  { %4161 = vmatprep.subr.bf16.mxu1 %v4684_v58  ;;  %4209 = vmatprep.subr.bf16.mxu0 %v4684_v58 }
 0x196   :  { %4163 = vmatpush3.bf16.msra.mxu1 %v5753_v47  ;;  %4211 = vmatpush3.bf16.msra.mxu0 %v5753_v47 }
 0x197   :  { %4164 = vmatprep.subr.bf16.mxu1 %v4684_v58  ;;  %4212 = vmatprep.subr.bf16.mxu0 %v4684_v58 }
 0x19a   :  { %4166 = vmatpush3.bf16.msra.mxu1 %v5765_v0  ;;  %4214 = vmatpush3.bf16.msra.mxu0 %v5765_v0 }
 0x19b   :  { %4167 = vmatprep.subr.bf16.mxu1 %v4684_v58 }
 0x1f5   :  { %v2125_v63 = vpop.f32.mrb[0].mxu0 }
 0x1f6   :  { %v2127_v1 = vpop.f32.mrb[1].mxu0  ;;  %v2497_v5 = vrot.slane %v2125_v63, 7 }
 0x1f7   :  { %v2129_v4 = vpop.f32.mrb[2].mxu0 }
 0x1f8   :  { %v2498_v7 = vrot.slane %v2129_v4, 7  ;;  %v2131_v35 = vpop.f32.mrb[3].mxu0 }
 0x1fa   :  { %v2512_v10 = vsel %vm2505_vm2, %v2497_v5, %v2498_v7 }
 0x1fb   :  { %v2556_v2 = vadd.f32 %v2512_v10, %v2131_v35 }
 0x1fd   :  { %v5779_v20 = vadd.f32 %v2556_v2, %v5651_v8  ;;  %v2135_v12 = vpop.f32.mrb[4].mxu0 }
 0x1fe   :  { %v2499_v15 = vrot.slane %v2135_v12, 7  ;;  %v2137_v18 = vpop.f32.mrb[5].mxu0 }
 0x1ff   :  { %v2139_v27 = vpop.f32.mrb[6].mxu0 }
 0x200   :  { %v2511_v45 = vsel %vm2505_vm2, %v2498_v7, %v2499_v15  ;;  %v2500_v23 = vrot.slane %v2139_v27, 7  ;;  %v2141_v24 = vpop.f32.mrb[7].mxu0 }
 0x201   :  { %v2557_v26 = vadd.f32 %v2511_v45, %v2137_v18 }
 0x202   :  { %v2510_v8 = vsel %vm2505_vm2, %v2499_v15, %v2500_v23 }
 0x203   :  { %v5791_v28 = vadd.f32 %v2557_v26, %v5643_v21  ;;  %v2558_v37 = vadd.f32 %v2510_v8, %v2141_v24 }
 0x205   :  { %v5796_v3 = vadd.f32 %v2558_v37, %v2550_v29  ;;  %v2145_v40 = vpop.f32.mrb[8].mxu0 }
 0x206   :  { %v2501_v6 = vrot.slane %v2145_v40, 7  ;;  %v2147_v25 = vpop.f32.mrb[9].mxu0 }
 0x207   :  { %v2149_v38 = vpop.f32.mrb[10].mxu0 }
 0x208   :  { %v2509_v39 = vsel %vm2505_vm2, %v2500_v23, %v2501_v6  ;;  %v2502_v21 = vrot.slane %v2149_v38, 7  ;;  %v2151_v42 = vpop.f32.mrb[11].mxu0 }
 0x209   :  { %v2518_v43 = vsel %vm5798_vm4, %v2509_v39, 0.0 }
 0x20a   :  { %v2559_v30 = vadd.f32 %v2518_v43, %v2147_v25  ;;  %v2508_v46 = vsel %vm2505_vm2, %v2501_v6, %v2502_v21  ;;  %v4649_v6 = vld [vmem:[%s6110_s2 + $0x4] ss:$12 sps:$4 sm:$0xff]   ;;  %v5872_v25 = vsub.s32 0, %v5638_v11 }
 0x20b   :  { %v2560_v49 = vadd.f32 %v2508_v46, %v2151_v42 }
 0x20c   :  { %v5810_v50 = vadd.f32 %v2559_v30, %v5667_v33 }
 0x20d   :  { %v5814_v53 = vadd.f32 %v2560_v49, %v5671_v34  ;;  %v2155_v55 = vpop.f32.mrb[12].mxu0 }
 0x20e   :  { %v2503_v59 = vrot.slane %v2155_v55, 7  ;;  %v2157_v61 = vpop.f32.mrb[13].mxu0 }
 0x20f   :  { %v2159_v63 = vpop.f32.mrb[14].mxu0 }
 0x210   :  { %v2507_v4 = vsel %vm2505_vm2, %v2502_v21, %v2503_v59  ;;  %v2504_v35 = vrot.slane %v2159_v63, 7  ;;  %v2161_v33 = vpop.f32.mrb[15].mxu0 }
 0x211   :  { %v2561_v9 = vadd.f32 %v2507_v4, %v2157_v61 }
 0x212   :  { %v2513_v34 = vsel %vm2505_vm2, %v2504_v35, %v2497_v5  ;;  %v2506_v2 = vsel %vm2505_vm2, %v2503_v59, %v2504_v35 }
 0x213   :  { %v5831_v12 = vadd.f32 %v2561_v9, %v5659_v13  ;;  %v2514_v14 = vsel %vm5818_vm5, %v2513_v34, 0.0  ;;  %v2562_v15 = vadd.f32 %v2506_v2, %v2161_v33 }
 0x214   :  { %v2555_v18 = vadd.f32 %v2514_v14, %v2127_v1 }
 0x215   :  { %v5838_v27 = vadd.f32 %v2562_v15, %v2554_v19 }
 0x216   :  { %v5841_v45 = vadd.f32 %v2555_v18, %v5647_v22 }
 0x218   :  { %v2571_v5 = vadd.f32 %v5779_v20, %v5841_v45 }
 0x21a   :  { %v2572_v13 = vadd.f32 %v2571_v5, %v5791_v28 }
 0x21c   :  { %v2573_v23 = vadd.f32 %v2572_v13, %v5796_v3 }
 0x21e   :  { %v2574_v24 = vadd.f32 %v2573_v23, %v5810_v50 }
 0x220   :  { %v2575_v1 = vadd.f32 %v2574_v24, %v5814_v53 }
 0x222   :  { %v2576_v26 = vadd.f32 %v2575_v1, %v5831_v12 }
 0x224   :  { %v2577_v16 = vadd.f32 %v2576_v26, %v5838_v27 }
 0x226   :  { %v2578_v8 = vrot.slane %v2577_v16, 4 }
 0x228   :  { %v2579_v60 = vadd.f32 %v2578_v8, %v2577_v16  ;;  %v4647_v8 = vld [vmem:[%s6110_s2] ss:$12 sps:$4 sm:$0xff]  }
 0x22a   :  { %v2580_v37 = vrot.slane %v2579_v60, 2 }
 0x22c   :  { %v2581_v22 = vadd.f32 %v2580_v37, %v2579_v60  ;;  %v4652_v37 = vld [vmem:[%s6110_s2 + $0x1c] ss:$12 sps:$4 sm:$0xff]  }
 0x22e   :  { %v2582_v29 = vrot.slane %v2581_v22, 1 }
 0x230   :  { %v2583_v40 = vadd.f32 %v2582_v29, %v2581_v22  ;;  %v4650_v22 = vld [vmem:[%s6110_s2 + $0x18] ss:$12 sps:$4 sm:$0xff]   ;;  %v4655_v29 = vld [vmem:[%s6110_s2 + $0x34] ss:$12 sps:$4 sm:$0xff]  }
 0x232   :  { %4012 = vmatmul.mubr.f32.vlgmr.msra.gmra.mrb[72].mxu1 %v2583_v40  ;;  %v4653_v40 = vld [vmem:[%s6110_s2 + $0x30] ss:$12 sps:$4 sm:$0xff]  }
 0x233   :  { %4169 = vmatpush3.bf16.msra.mxu1 %v5679_v36  ;;  %4046 = vmatprep.mubr.msk.f32.mxu1 %vm4685_vm1, %v4686_v62 }
 0x234   :  { %4170 = vmatprep.subr.bf16.mxu1 %v4684_v58 }
 0x237   :  { %4172 = vmatpush3.bf16.msra.mxu1 %v5693_v41 }
 0x238   :  { %4173 = vmatprep.subr.bf16.mxu1 %v4684_v58 }
 0x23b   :  { %4175 = vmatpush3.bf16.msra.mxu1 %v5705_v44 }
 0x23c   :  { %4176 = vmatprep.subr.bf16.mxu1 %v4684_v58 }
 0x23f   :  { %4178 = vmatpush3.bf16.msra.mxu1 %v5717_v48 }
 0x240   :  { %4179 = vmatprep.subr.bf16.mxu1 %v4684_v58 }
 0x243   :  { %4181 = vmatpush3.bf16.msra.mxu1 %v5729_v51 }
 0x244   :  { %4182 = vmatprep.subr.bf16.mxu1 %v4684_v58 }
 0x247   :  { %4184 = vmatpush3.bf16.msra.mxu1 %v5741_v54 }
 0x248   :  { %4185 = vmatprep.subr.bf16.mxu1 %v4684_v58 }
 0x24b   :  { %4187 = vmatpush3.bf16.msra.mxu1 %v5753_v47 }
 0x24c   :  { %4188 = vmatprep.subr.bf16.mxu1 %v4684_v58 }
 0x24f   :  { %4190 = vmatpush3.bf16.msra.mxu1 %v5765_v0 }
 0x250   :  { %2982 = vmatprep.subr.bf16.mxu1 %v4649_v6  ;;  %v4658_v6 = vld [vmem:[%s6110_s2 + $0x4c] ss:$12 sps:$4 sm:$0xff]  }
 0x305   :  { %v2666_v38 = vpop.f32.mrb[72].mxu1 }
 0x306   :  { %v5874_v39 = vmul.f32 0.00048828125, %v2666_v38  ;;  %v4013_v21 = vpop.f32.mrb[73].mxu1  ;;  %v4656_v38 = vld [vmem:[%s6110_s2 + $0x48] ss:$12 sps:$4 sm:$0xff]  }
 0x307   :  { %v4661_v21 = vld [vmem:[%s6110_s2 + $0x64] ss:$12 sps:$4 sm:$0xff]  }
 0x308   :  { %v2674_v42 = vrot.slane %v5874_v39, %v5872_v25 }
 0x30a   :  { %v2675_v43 = vsub.f32 %v5841_v45, %v2674_v42  ;;  %v2676_v32 = vsub.f32 %v5779_v20, %v2674_v42  ;;  %v2677_v30 = vsub.f32 %v5791_v28, %v2674_v42  ;;  %v2678_v46 = vsub.f32 %v5796_v3, %v2674_v42 }
 0x30b   :  { %v2679_v55 = vsub.f32 %v5810_v50, %v2674_v42  ;;  %v2680_v61 = vsub.f32 %v5814_v53, %v2674_v42  ;;  %v2681_v35 = vsub.f32 %v5831_v12, %v2674_v42  ;;  %v2682_v34 = vsub.f32 %v5838_v27, %v2674_v42  ;;  %v4659_v42 = vld [vmem:[%s6110_s2 + $0x60] ss:$12 sps:$4 sm:$0xff]  }
 0x30c   :  { %v2683_v49 = vmul.f32 %v2675_v43, %v2675_v43  ;;  %v2684_v52 = vmul.f32 %v2676_v32, %v2676_v32  ;;  %v2685_v56 = vmul.f32 %v2677_v30, %v2677_v30  ;;  %v2686_v63 = vmul.f32 %v2678_v46, %v2678_v46  ;;  %v4664_v43 = vld [vmem:[%s6110_s2 + $0x7c] ss:$12 sps:$4 sm:$0xff]   ;;  %v4662_v32 = vld [vmem:[%s6110_s2 + $0x78] ss:$12 sps:$4 sm:$0xff]   ;;  %v4667_v30 = vld [vmem:[%s6110_s2 + $0x94] ss:$12 sps:$4 sm:$0xff]  }
 0x30d   :  { %v2687_v33 = vmul.f32 %v2679_v55, %v2679_v55  ;;  %v2688_v2 = vmul.f32 %v2680_v61, %v2680_v61  ;;  %v2689_v15 = vmul.f32 %v2681_v35, %v2681_v35  ;;  %v2690_v19 = vmul.f32 %v2682_v34, %v2682_v34  ;;  %v4665_v46 = vld [vmem:[%s6110_s2 + $0x90] ss:$12 sps:$4 sm:$0xff]   ;;  %v4671_v55 = vld [vmem:[%s6110_s2 + $0x8] ss:$12 sps:$4 sm:$0xff]  }
 0x30e   :  { %v2691_v59 = vadd.f32 %v2684_v52, %v2683_v49  ;;  %v4670_v49 = vld [vmem:[%s6110_s2 + $0xac] ss:$12 sps:$4 sm:$0xff]   ;;  %v4668_v52 = vld [vmem:[%s6110_s2 + $0xa8] ss:$12 sps:$4 sm:$0xff]  }
 0x310   :  { %v2692_v4 = vadd.f32 %v2691_v59, %v2685_v56 }
 0x312   :  { %v2693_v9 = vadd.f32 %v2692_v4, %v2686_v63  ;;  %v2775_v4 = vld [vmem:[%s6111_s4] sm:$0x1] }
 0x314   :  { %v2694_v14 = vadd.f32 %v2693_v9, %v2687_v33  ;;  %v2779_v9 = vld [vmem:[%s6112_s5] sm:$0x1] }
 0x316   :  { %v2695_v18 = vadd.f32 %v2694_v14, %v2688_v2 }
 0x318   :  { %v2696_v5 = vadd.f32 %v2695_v18, %v2689_v15 }
 0x31a   :  { %v2697_v13 = vadd.f32 %v2696_v5, %v2690_v19 }
 0x31c   :  { %v2698_v23 = vrot.slane %v2697_v13, 4 }
 0x31e   :  { %v2699_v24 = vadd.f32 %v2698_v23, %v2697_v13 }
 0x320   :  { %v2700_v1 = vrot.slane %v2699_v24, 2 }
 0x322   :  { %v2701_v26 = vadd.f32 %v2700_v1, %v2699_v24 }
 0x324   :  { %v2702_v16 = vrot.slane %v2701_v26, 1 }
 0x326   :  { %v2703_v60 = vadd.f32 %v2702_v16, %v2701_v26 }
 0x328   :  { %4047 = vmatmul.mubr.f32.vlgmr.msra.gmra.mrb[74].mxu1 %v2703_v60 }
 0x329   :  { %2983 = vmatpush1.bf16.msra.mxu1 %v4647_v8  ;;  %3014 = vmatprep.mubr.bf16.mxu1 %v4683_v17 }
 0x32a   :  { %2984 = vmatprep.subr.bf16.mxu1 %v4652_v37 }
 0x32d   :  { %2985 = vmatpush1.bf16.msra.mxu1 %v4650_v22 }
 0x32e   :  { %2986 = vmatprep.subr.bf16.mxu1 %v4655_v29  ;;  %v4674_v29 = vld [vmem:[%s6110_s2 + $0x50] ss:$12 sps:$4 sm:$0xff]  }
 0x331   :  { %2987 = vmatpush1.bf16.msra.mxu1 %v4653_v40 }
 0x332   :  { %2988 = vmatprep.subr.bf16.mxu1 %v4658_v6 }
 0x335   :  { %2989 = vmatpush1.bf16.msra.mxu1 %v4656_v38 }
 0x336   :  { %2990 = vmatprep.subr.bf16.mxu1 %v4661_v21 }
 0x339   :  { %2991 = vmatpush1.bf16.msra.mxu1 %v4659_v42 }
 0x33a   :  { %2992 = vmatprep.subr.bf16.mxu1 %v4664_v43 }
 0x33d   :  { %2993 = vmatpush1.bf16.msra.mxu1 %v4662_v32  ;;  %v4676_v32 = vld [vmem:[%s6110_s2 + $0x80] ss:$12 sps:$4 sm:$0xff]  }
 0x33e   :  { %2994 = vmatprep.subr.bf16.mxu1 %v4667_v30 }
 0x341   :  { %2995 = vmatpush1.bf16.msra.mxu1 %v4665_v46 }
 0x342   :  { %2996 = vmatprep.subr.bf16.mxu1 %v4670_v49 }
 0x345   :  { %2997 = vmatpush1.bf16.msra.mxu1 %v4668_v52 }
 0x346   :  { %4049 = vmatprep.subr.bf16.mxu1 %v4671_v55 }
 0x3fb   :  { %v2770_v56 = vpop.f32.mrb[74].mxu1 }
 0x3fc   :  { %v2774_v59 = vmul.f32 0.00048828125, %v2770_v56  ;;  %v4048_v61 = vpop.f32.mrb[75].mxu1 }
 0x3fe   :  { %v2776_v63 = vadd.f32 1e-05, %v2774_v59 }
 0x400   :  { %4679 = vrsqrt.f32 %v2776_v63 }
 0x40a   :  { %v4680_v35 = vpop.eup %4679 }
 0x40b   :  { %v2778_v33 = vmul.f32 %v4680_v35, %v2775_v4 }
 0x40d   :  { %v2780_v34 = vmul.f32 %v2778_v33, %v5874_v39  ;;  %v2786_v2 = vrot.slane %v2778_v33, %v5872_v25  ;;  %v4672_v39 = vld [vmem:[%s6110_s2 + $0x20] ss:$12 sps:$4 sm:$0xff]  }
 0x40f   :  { %v2781_v14 = vsub.f32 %v2779_v9, %v2780_v34  ;;  %v2788_v18 = vmul.f32 %v2786_v2, %v5841_v45  ;;  %v2789_v19 = vmul.f32 %v2786_v2, %v5779_v20  ;;  %v2790_v1 = vmul.f32 %v2786_v2, %v5791_v28  ;;  %v4673_v28 = vld [vmem:[%s6110_s2 + $0x38] ss:$12 sps:$4 sm:$0xff]  }
 0x410   :  { %v2791_v26 = vmul.f32 %v2786_v2, %v5796_v3  ;;  %v2792_v3 = vmul.f32 %v2786_v2, %v5810_v50  ;;  %v2793_v37 = vmul.f32 %v2786_v2, %v5814_v53  ;;  %v4675_v50 = vld [vmem:[%s6110_s2 + $0x68] ss:$12 sps:$4 sm:$0xff]   ;;  %v2794_v53 = vmul.f32 %v2786_v2, %v5831_v12  ;;  %v4677_v12 = vld [vmem:[%s6110_s2 + $0x98] ss:$12 sps:$4 sm:$0xff]  }
 0x411   :  { %v2800_v15 = vrot.slane %v2781_v14, %v5872_v25  ;;  %v2795_v42 = vmul.f32 %v2786_v2, %v5838_v27 }
 0x413   :  { %v2802_v5 = vadd.f32 %v2800_v15, %v2788_v18  ;;  %v2803_v13 = vadd.f32 %v2800_v15, %v2789_v19  ;;  %v2804_v8 = vadd.f32 %v2800_v15, %v2790_v1  ;;  %v2805_v60 = vadd.f32 %v2800_v15, %v2791_v26 }
 0x414   :  { %v2806_v40 = vadd.f32 %v2800_v15, %v2792_v3  ;;  %v2807_v6 = vadd.f32 %v2800_v15, %v2793_v37  ;;  %v2808_v30 = vadd.f32 %v2800_v15, %v2794_v53  ;;  %v2809_v46 = vadd.f32 %v2800_v15, %v2795_v42 }
 0x415   :  { %v2810_v23 = vmax.f32 %v2802_v5, 0.0  ;;  %v2811_v24 = vmax.f32 %v2803_v13, 0.0  ;;  %v2812_v20 = vmax.f32 %v2804_v8, 0.0  ;;  %v2813_v45 = vmax.f32 %v2805_v60, 0.0 }
 0x416   :  { %v2814_v38 = vmax.f32 %v2806_v40, 0.0  ;;  %v2815_v21 = vmax.f32 %v2807_v6, 0.0  ;;  %v2816_v49 = vmax.f32 %v2808_v30, 0.0  ;;  %v2817_v52 = vmax.f32 %v2809_v46, 0.0 }
 0x417   :  { %v2818_v16 = vpack.c.bf16 %v2811_v24, %v2810_v23  ;;  %v2819_v22 = vpack.c.bf16 %v2813_v45, %v2812_v20 }
 0x418   :  { %v2820_v43 = vpack.c.bf16 %v2815_v21, %v2814_v38  ;;  %v2821_v27 = vpack.c.bf16 %v2817_v52, %v2816_v49 }
 0x419   :  { %3015 = vmatmul.mubr.bf16.vlgmr.msra.gmra.mrb[76].mxu1 %v2818_v16 }
 0x41a   :  { %4050 = vmatpush3.bf16.msra.mxu1 %v4671_v55  ;;  %3024 = vmatprep.mubr.bf16.mxu1 %v4683_v17  ;;  %v4678_v55 = vld [vmem:[%s6110_s2 + $0xb0] ss:$12 sps:$4 sm:$0xff]  }
 0x41b   :  { %4051 = vmatprep.subr.bf16.mxu1 %v4672_v39 }
 0x41e   :  { %4052 = vmatpush3.bf16.msra.mxu1 %v4672_v39 }
 0x41f   :  { %4053 = vmatprep.subr.bf16.mxu1 %v4673_v28 }
 0x421   :  { %3025 = vmatmul.mubr.bf16.gmra.mrb[80].mxu1 %v2819_v22 }
 0x422   :  { %4054 = vmatpush3.bf16.msra.mxu1 %v4673_v28  ;;  %3034 = vmatprep.mubr.bf16.mxu1 %v4683_v17 }
 0x423   :  { %4055 = vmatprep.subr.bf16.mxu1 %v4674_v29 }
 0x426   :  { %4056 = vmatpush3.bf16.msra.mxu1 %v4674_v29 }
 0x427   :  { %4057 = vmatprep.subr.bf16.mxu1 %v4675_v50 }
 0x429   :  { %3035 = vmatmul.mubr.bf16.gmra.mrb[84].mxu1 %v2820_v43 }
 0x42a   :  { %4058 = vmatpush3.bf16.msra.mxu1 %v4675_v50  ;;  %3044 = vmatprep.mubr.bf16.mxu1 %v4683_v17 }
 0x42b   :  { %4059 = vmatprep.subr.bf16.mxu1 %v4676_v32 }
 0x42e   :  { %4060 = vmatpush3.bf16.msra.mxu1 %v4676_v32 }
 0x42f   :  { %4061 = vmatprep.subr.bf16.mxu1 %v4677_v12 }
 0x431   :  { %3045 = vmatmul.mubr.bf16.gmra.mrb[88].mxu1 %v2821_v27 }
 0x432   :  { %4062 = vmatpush3.bf16.msra.mxu1 %v4677_v12  ;;  %4065 = vmatprep.mubr.bf16.mxu1 %v2818_v16 }
 0x433   :  { %4063 = vmatprep.subr.bf16.mxu1 %v4678_v55 }
 0x436   :  { %4064 = vmatpush3.bf16.msra.mxu1 %v4678_v55 }
 0x437   :  { %4215 = vmatprep.subr.bf16.mxu1 %v4684_v58 }
 0x439   :  { %4066 = vmatmul.mubr.bf16.vlgmr.msra.gmra.mrb[92].mxu1 %v2819_v22 }
 0x43a   :  { %4069 = vmatprep.mubr.bf16.mxu1 %v2820_v43  ;;  %4217 = vmatpush3.bf16.msra.mxu1 %v5679_v36 }
 0x43b   :  { %4218 = vmatprep.subr.bf16.mxu1 %v4684_v58 }
 0x43e   :  { %4220 = vmatpush3.bf16.msra.mxu1 %v5693_v41 }
 0x43f   :  { %4221 = vmatprep.subr.bf16.mxu1 %v4684_v58 }
 0x441   :  { %4070 = vmatmul.mubr.bf16.gmra.mrb[96].mxu1 %v2821_v27 }
 0x442   :  { %4223 = vmatpush3.bf16.msra.mxu1 %v5705_v44  ;;  %4140 = vmatprep.mubr.msk.f32.mxu1 %vm4685_vm1, %v4686_v62 }
 0x443   :  { %4224 = vmatprep.subr.bf16.mxu1 %v4684_v58 }
 0x446   :  { %4226 = vmatpush3.bf16.msra.mxu1 %v5717_v48 }
 0x447   :  { %4227 = vmatprep.subr.bf16.mxu1 %v4684_v58 }
 0x44a   :  { %4229 = vmatpush3.bf16.msra.mxu1 %v5729_v51 }
 0x44b   :  { %4230 = vmatprep.subr.bf16.mxu1 %v4684_v58 }
 0x44e   :  { %4232 = vmatpush3.bf16.msra.mxu1 %v5741_v54 }
 0x44f   :  { %4233 = vmatprep.subr.bf16.mxu1 %v4684_v58 }
 0x452   :  { %4235 = vmatpush3.bf16.msra.mxu1 %v5753_v47 }
 0x453   :  { %4236 = vmatprep.subr.bf16.mxu1 %v4684_v58 }
 0x456   :  { %4238 = vmatpush3.bf16.msra.mxu1 %v5765_v0 }
 0x4ec   :  { %v3016_v17 = vpop.f32.mrb[76].mxu1 }
 0x4ed   :  { %v3018_v36 = vpop.f32.mrb[77].mxu1  ;;  %v3120_v44 = vrot.slane %v3016_v17, 7 }
 0x4ee   :  { %v3020_v41 = vpop.f32.mrb[78].mxu1 }
 0x4ef   :  { %v3121_v48 = vrot.slane %v3020_v41, 7  ;;  %v3022_v62 = vpop.f32.mrb[79].mxu1 }
 0x4f1   :  { %v3134_v51 = vsel %vm2505_vm2, %v3120_v44, %v3121_v48 }
 0x4f2   :  { %v3169_v56 = vadd.f32 %v3134_v51, %v3022_v62 }
 0x4f4   :  { %v3026_v59 = vpop.f32.mrb[80].mxu1 }
 0x4f5   :  { %v3122_v54 = vrot.slane %v3026_v59, 7  ;;  %v3028_v61 = vpop.f32.mrb[81].mxu1 }
 0x4f6   :  { %v3030_v63 = vpop.f32.mrb[82].mxu1 }
 0x4f7   :  { %v3133_v47 = vsel %vm2505_vm2, %v3121_v48, %v3122_v54  ;;  %v3123_v58 = vrot.slane %v3030_v63, 7  ;;  %v3032_v4 = vpop.f32.mrb[83].mxu1 }
 0x4f8   :  { %v3170_v0 = vadd.f32 %v3133_v47, %v3028_v61 }
 0x4f9   :  { %v3132_v35 = vsel %vm2505_vm2, %v3122_v54, %v3123_v58 }
 0x4fa   :  { %v3171_v33 = vadd.f32 %v3132_v35, %v3032_v4 }
 0x4fc   :  { %v3036_v9 = vpop.f32.mrb[84].mxu1 }
 0x4fd   :  { %v3124_v34 = vrot.slane %v3036_v9, 7  ;;  %v3038_v2 = vpop.f32.mrb[85].mxu1 }
 0x4fe   :  { %v3040_v14 = vpop.f32.mrb[86].mxu1 }
 0x4ff   :  { %v3131_v15 = vsel %vm2505_vm2, %v3123_v58, %v3124_v34  ;;  %v3125_v18 = vrot.slane %v3040_v14, 7  ;;  %v3042_v19 = vpop.f32.mrb[87].mxu1 }
 0x500   :  { %v3140_v5 = vsel %vm5798_vm4, %v3131_v15, 0.0 }
 0x501   :  { %v3172_v13 = vadd.f32 %v3140_v5, %v3038_v2  ;;  %v3130_v23 = vsel %vm2505_vm2, %v3124_v34, %v3125_v18 }
 0x502   :  { %v3173_v24 = vadd.f32 %v3130_v23, %v3042_v19 }
 0x504   :  { %v3046_v1 = vpop.f32.mrb[88].mxu1 }
 0x505   :  { %v3126_v26 = vrot.slane %v3046_v1, 7  ;;  %v3048_v16 = vpop.f32.mrb[89].mxu1 }
 0x506   :  { %v3050_v39 = vpop.f32.mrb[90].mxu1 }
 0x507   :  { %v3129_v8 = vsel %vm2505_vm2, %v3125_v18, %v3126_v26  ;;  %v3127_v60 = vrot.slane %v3050_v39, 7  ;;  %v3052_v20 = vpop.f32.mrb[91].mxu1 }
 0x508   :  { %v3174_v45 = vadd.f32 %v3129_v8, %v3048_v16 }
 0x509   :  { %v3135_v28 = vsel %vm2505_vm2, %v3127_v60, %v3120_v44  ;;  %v3128_v31 = vsel %vm2505_vm2, %v3126_v26, %v3127_v60 }
 0x50a   :  { %v3136_v3 = vsel %vm5818_vm5, %v3135_v28, 0.0  ;;  %v3175_v37 = vadd.f32 %v3128_v31, %v3052_v20 }
 0x50b   :  { %v3168_v22 = vadd.f32 %v3136_v3, %v3018_v36 }
 0x50c   :  { %v4067_v29 = vpop.f32.mrb[92].mxu1 }
 0x50d   :  { %v3089_v40 = vpop.f32.mrb[93].mxu1  ;;  %v3146_v38 = vrot.slane %v4067_v29, 1 }
 0x50e   :  { %v4068_v6 = vpop.f32.mrb[94].mxu1  ;;  %v3144_v53 = vrot.slane %v3089_v40, 1 }
 0x50f   :  { %v3147_v21 = vrot.slane %v4068_v6, 1  ;;  %v3092_v50 = vpop.f32.mrb[95].mxu1 }
 0x510   :  { %v3145_v42 = vrot.slane %v3092_v50, 1 }
 0x511   :  { %v3156_v43 = vsel %vm2538_vm0, %v3146_v38, %v3147_v21 }
 0x512   :  { %v6016_v32 = vadd.f32 %v3170_v0, %v3156_v43  ;;  %v3157_v30 = vsel %vm2538_vm0, %v3145_v42, %v3146_v38  ;;  %v3158_v7 = vsel %vm2538_vm0, %v3144_v53, %v3145_v42 }
 0x513   :  { %v6022_v46 = vadd.f32 %v3168_v22, %v3158_v7  ;;  %v6024_v49 = vadd.f32 %v3169_v56, %v3157_v30 }
 0x514   :  { %v4071_v52 = vpop.f32.mrb[96].mxu1 }
 0x515   :  { %v3184_v12 = vadd.f32 %v6024_v49, %v6022_v46  ;;  %v3105_v27 = vpop.f32.mrb[97].mxu1  ;;  %v3150_v36 = vrot.slane %v4071_v52, 1 }
 0x516   :  { %v3148_v55 = vrot.slane %v3105_v27, 1  ;;  %v4072_v17 = vpop.f32.mrb[98].mxu1 }
 0x517   :  { %v3151_v41 = vrot.slane %v4072_v17, 1  ;;  %v3108_v44 = vpop.f32.mrb[99].mxu1  ;;  %v3185_v51 = vadd.f32 %v3184_v12, %v6016_v32 }
 0x518   :  { %v3155_v48 = vsel %vm2538_vm0, %v3147_v21, %v3148_v55  ;;  %v3149_v62 = vrot.slane %v3108_v44, 1 }
 0x519   :  { %v3163_v56 = vsel %vm5784_vm3, %v3155_v48, 0.0  ;;  %v3152_v59 = vsel %vm2538_vm0, %v3150_v36, %v3151_v41  ;;  %v3159_v54 = vsel %vm2538_vm0, %v3151_v41, %v3144_v53 }
 0x51a   :  { %v6037_v61 = vadd.f32 %v3171_v33, %v3163_v56  ;;  %v3167_v63 = vsel %vm5822_vm6, %v3159_v54, 0.0  ;;  %v6041_v47 = vadd.f32 %v3174_v45, %v3152_v59  ;;  %v3153_v58 = vsel %vm2538_vm0, %v3149_v62, %v3150_v36  ;;  %v3376_v54 = vld [vmem:[%s6114_s7] sm:$0x1] }
 0x51b   :  { %v6045_v4 = vadd.f32 %v3175_v37, %v3167_v63  ;;  %v3154_v57 = vsel %vm2538_vm0, %v3148_v55, %v3149_v62  ;;  %v6049_v0 = vadd.f32 %v3173_v24, %v3153_v58 }
 0x51c   :  { %v3186_v35 = vadd.f32 %v3185_v51, %v6037_v61  ;;  %v6052_v9 = vadd.f32 %v3172_v13, %v3154_v57  ;;  %v3372_v51 = vld [vmem:[%s6113_s6] sm:$0x1] }
 0x51e   :  { %v3187_v33 = vadd.f32 %v3186_v35, %v6052_v9 }
 0x520   :  { %v3188_v10 = vadd.f32 %v3187_v33, %v6049_v0 }
 0x522   :  { %v3189_v34 = vadd.f32 %v3188_v10, %v6041_v47 }
 0x524   :  { %v3190_v2 = vadd.f32 %v3189_v34, %v6045_v4 }
 0x526   :  { %v3191_v14 = vrot.slane %v3190_v2, 4 }
 0x528   :  { %v3192_v15 = vadd.f32 %v3191_v14, %v3190_v2 }
 0x52a   :  { %v3193_v18 = vrot.slane %v3192_v15, 2 }
 0x52c   :  { %v3194_v19 = vadd.f32 %v3193_v18, %v3192_v15 }
 0x52e   :  { %v3195_v11 = vrot.slane %v3194_v19, 1 }
 0x530   :  { %v3196_v5 = vadd.f32 %v3195_v11, %v3194_v19 }
 0x532   :  { %4106 = vmatmul.mubr.f32.vlgmr.msra.gmra.mrb[16].mxu0 %v3196_v5 }
 0x605   :  { %v3263_v23 = vpop.f32.mrb[16].mxu0 }
 0x606   :  { %v3267_v24 = vmul.f32 0.00048828125, %v3263_v23  ;;  %v4107_v1 = vpop.f32.mrb[17].mxu0 }
 0x608   :  { %v3271_v13 = vrot.slane %v3267_v24, %v5872_v25 }
 0x60a   :  { %v3272_v26 = vsub.f32 %v6022_v46, %v3271_v13  ;;  %v3273_v16 = vsub.f32 %v6024_v49, %v3271_v13  ;;  %v3274_v39 = vsub.f32 %v6016_v32, %v3271_v13  ;;  %v3275_v8 = vsub.f32 %v6037_v61, %v3271_v13 }
 0x60b   :  { %v3276_v45 = vsub.f32 %v6052_v9, %v3271_v13  ;;  %v3277_v3 = vsub.f32 %v6049_v0, %v3271_v13  ;;  %v3278_v29 = vsub.f32 %v6041_v47, %v3271_v13  ;;  %v3279_v38 = vsub.f32 %v6045_v4, %v3271_v13 }
 0x60c   :  { %v3280_v60 = vmul.f32 %v3272_v26, %v3272_v26  ;;  %v3281_v20 = vmul.f32 %v3273_v16, %v3273_v16  ;;  %v3282_v28 = vmul.f32 %v3274_v39, %v3274_v39  ;;  %v3283_v37 = vmul.f32 %v3275_v8, %v3275_v8 }
 0x60d   :  { %v3284_v40 = vmul.f32 %v3276_v45, %v3276_v45  ;;  %v3285_v21 = vmul.f32 %v3277_v3, %v3277_v3  ;;  %v3286_v53 = vmul.f32 %v3278_v29, %v3278_v29  ;;  %v3287_v43 = vmul.f32 %v3279_v38, %v3279_v38 }
 0x60e   :  { %v3288_v31 = vadd.f32 %v3281_v20, %v3280_v60 }
 0x610   :  { %v3289_v22 = vadd.f32 %v3288_v31, %v3282_v28 }
 0x612   :  { %v3290_v6 = vadd.f32 %v3289_v22, %v3283_v37 }
 0x614   :  { %v3291_v50 = vadd.f32 %v3290_v6, %v3284_v40 }
 0x616   :  { %v3292_v42 = vadd.f32 %v3291_v50, %v3285_v21 }
 0x618   :  { %v3293_v30 = vadd.f32 %v3292_v42, %v3286_v53 }
 0x61a   :  { %v3294_v7 = vadd.f32 %v3293_v30, %v3287_v43 }
 0x61c   :  { %v3295_v52 = vrot.slane %v3294_v7, 4 }
 0x61e   :  { %v3296_v12 = vadd.f32 %v3295_v52, %v3294_v7 }
 0x620   :  { %v3297_v27 = vrot.slane %v3296_v12, 2 }
 0x622   :  { %v3298_v55 = vadd.f32 %v3297_v27, %v3296_v12 }
 0x624   :  { %v3299_v17 = vrot.slane %v3298_v55, 1 }
 0x626   :  { %v3300_v36 = vadd.f32 %v3299_v17, %v3298_v55 }
 0x628   :  { %4141 = vmatmul.mubr.f32.vlgmr.msra.gmra.mrb[100].mxu1 %v3300_v36 }
 0x6fb   :  { %v3367_v41 = vpop.f32.mrb[100].mxu1 }
 0x6fc   :  { %v3371_v44 = vmul.f32 0.00048828125, %v3367_v41  ;;  %v4142_v48 = vpop.f32.mrb[101].mxu1 }
 0x6fe   :  { %v3373_v62 = vadd.f32 1e-05, %v3371_v44 }
 0x700   :  { %4681 = vrsqrt.f32 %v3373_v62 }
 0x70a   :  { %v4682_v56 = vpop.eup %4681 }
 0x70b   :  { %v3375_v59 = vmul.f32 %v4682_v56, %v3372_v51 }
 0x70d   :  { %v3377_v63 = vmul.f32 %v3375_v59, %v3267_v24  ;;  %v3383_v58 = vrot.slane %v3375_v59, %v5872_v25 }
 0x70f   :  { %v3378_v57 = vsub.f32 %v3376_v54, %v3377_v63  ;;  %v3385_v35 = vmul.f32 %v3383_v58, %v6022_v46  ;;  %v3386_v33 = vmul.f32 %v3383_v58, %v6024_v49  ;;  %v3387_v10 = vmul.f32 %v3383_v58, %v6016_v32 }
 0x710   :  { %v3388_v34 = vmul.f32 %v3383_v58, %v6037_v61  ;;  %v3389_v14 = vmul.f32 %v3383_v58, %v6052_v9  ;;  %v3390_v15 = vmul.f32 %v3383_v58, %v6049_v0  ;;  %v3391_v18 = vmul.f32 %v3383_v58, %v6041_v47 }
 0x711   :  { %v3397_v2 = vrot.slane %v3378_v57, %v5872_v25  ;;  %v3392_v19 = vmul.f32 %v3383_v58, %v6045_v4 }
 0x713   :  { %v3399_v11 = vadd.f32 %v3397_v2, %v3385_v35  ;;  %v3400_v5 = vadd.f32 %v3397_v2, %v3386_v33  ;;  %v3401_v23 = vadd.f32 %v3397_v2, %v3387_v10  ;;  %v3402_v46 = vadd.f32 %v3397_v2, %v3388_v34 }
 0x714   :  { %v3403_v24 = vadd.f32 %v3397_v2, %v3389_v14  ;;  %v3404_v49 = vadd.f32 %v3397_v2, %v3390_v15  ;;  %v3405_v1 = vadd.f32 %v3397_v2, %v3391_v18  ;;  %v3406_v32 = vadd.f32 %v3397_v2, %v3392_v19 }
 0x715   :  { %v3407_v13 = vmax.f32 %v3399_v11, 0.0  ;;  %v3408_v61 = vmax.f32 %v3400_v5, 0.0  ;;  %v3409_v26 = vmax.f32 %v3401_v23, 0.0  ;;  %v3410_v25 = vmax.f32 %v3402_v46, 0.0 }
 0x716   :  { %v3411_v16 = vmax.f32 %v3403_v24, 0.0  ;;  %v3412_v9 = vmax.f32 %v3404_v49, 0.0  ;;  %v3413_v39 = vmax.f32 %v3405_v1, 0.0  ;;  %v3414_v0 = vmax.f32 %v3406_v32, 0.0 }
 0x717   :  { %3415 = vst [vmem:[%s6115_s8] sm:$0xff] %v3407_v13  ;;  %3416 = vst [vmem:[%s6115_s8 + $0x8] sm:$0xff] %v3408_v61 }
 0x718   :  { %3417 = vst [vmem:[%s6115_s8 + $0x10] sm:$0xff] %v3409_v26  ;;  %3418 = vst [vmem:[%s6115_s8 + $0x18] sm:$0xff] %v3410_v25 }
 0x719   :  { %3419 = vst [vmem:[%s6115_s8 + $0x20] sm:$0xff] %v3411_v16  ;;  %3420 = vst [vmem:[%s6115_s8 + $0x28] sm:$0xff] %v3412_v9 }
 0x71a   :  { %3421 = vst [vmem:[%s6115_s8 + $0x30] sm:$0xff] %v3413_v39  ;;  %3422 = vst [vmem:[%s6115_s8 + $0x38] sm:$0xff] %v3414_v0 }

</bundles_post_ra>
